<compile_context>
chip_gen: v5e
topology: v5e:2x2
jax: 0.10.0
libtpu: 0.0.40
codegen_flags: <defaults>
</compile_context>

<pallas_src>
import jax
import jax.numpy as jnp
from jax.experimental import pallas as pl
from jax.experimental.pallas import tpu as pltpu


def _rup(x, m=128):
    return ((x + m - 1) // m) * m


# ----------------------------------------------------------------------------
# Stage 1: per-point MLP chain (Conv1d k=1 stack) + online max-pool.
# ----------------------------------------------------------------------------
def pointwise_kernel(x_ref, w1_ref, w2_ref, w3_ref, w4_ref, w5_ref, bias_ref,
                     g_ref, acc_ref):
    nj = pl.program_id(1)

    @pl.when(nj == 0)
    def _():
        # ReLU outputs are >= 0, so zero-init is an exact identity for max.
        acc_ref[...] = jnp.zeros_like(acc_ref)

    Bt, Nt, Cin = x_ref.shape
    x = x_ref[...].reshape(Bt * Nt, Cin)

    def layer(h_bf16, w_ref, brow):
        # w_ref holds W^T (Cin_pad, Cout_pad) in bf16; accumulate in f32.
        cout = w_ref.shape[1]                       # multiple of 128
        y = jnp.dot(h_bf16, w_ref[...], preferred_element_type=jnp.float32)
        y = y + bias_ref[brow:brow + 1, :cout]      # f32 bias, lane-dense slice
        # keep inter-layer activations in bf16 (same numerics as casting at
        # the next dot, half the live bytes / vreg pressure)
        return jnp.maximum(y, 0.0).astype(jnp.bfloat16)

    h = layer(x.astype(jnp.bfloat16), w1_ref, 0)
    h = layer(h, w2_ref, 1)
    h = layer(h, w3_ref, 2)
    h = layer(h, w4_ref, 3)
    h = layer(h, w5_ref, 4)

    # AdaptiveMaxPool1d(1): online max over this chunk of points.
    cmax = jnp.max(h.reshape(Bt, Nt, h.shape[-1]), axis=1)
    acc_ref[...] = jnp.maximum(acc_ref[...], cmax)

    @pl.when(nj == pl.num_programs(1) - 1)
    def _():
        g_ref[...] = acc_ref[...]


# ----------------------------------------------------------------------------
# Stage 2: top head (Linear 1024s->512s + ReLU, Linear 512s->repr).
# ----------------------------------------------------------------------------
def head_kernel(g_ref, wt1_ref, wt2_ref, bias_ref, out_ref):
    c1 = wt1_ref.shape[1]
    c2 = wt2_ref.shape[1]
    t = jnp.dot(g_ref[...], wt1_ref[...], preferred_element_type=jnp.float32)
    t = jnp.maximum(t + bias_ref[0:1, :c1], 0.0)
    t = jnp.dot(t.astype(jnp.bfloat16), wt2_ref[...],
                preferred_element_type=jnp.float32)
    out_ref[...] = t + bias_ref[1:2, :c2]           # final Linear, no ReLU


# ----------------------------------------------------------------------------
# Spec / tiling helpers.
# ----------------------------------------------------------------------------
def _resident_spec(shape):
    """Constant-index (grid-resident) operand: single-buffered."""
    zeros = (0,) * len(shape)
    return pl.BlockSpec(shape, lambda *args: zeros,
                        pipeline_mode=pl.Buffered(1))


def _pick_tiles(B, N, c_widest, act_budget_bytes=16 << 20, target_rows=1024):
    """Pick (Bt, Nt): rows per fused matmul = Bt*Nt.  Fill the MXU M dim
    (>= target_rows when the problem allows) while keeping the widest f32
    intermediate (rows, c_widest) under the activation budget."""
    row_cap = max(128, min(2048, act_budget_bytes // (4 * c_widest)))
    # Nt: largest divisor of N within the cap; prefer multiples of 8 so the
    # (Bt,Nt,*) <-> (Bt*Nt,*) reshapes stay sublane-aligned when chunking.
    divs_n = [d for d in range(1, N + 1) if N % d == 0 and d <= row_cap]
    aligned = [d for d in divs_n if d % 8 == 0 or d == N]
    nt = max(aligned) if aligned else max(divs_n)
    # Bt: smallest divisor of B that reaches target_rows (keeps several grid
    # blocks when possible); otherwise the largest that fits the cap.
    cands = [d for d in range(1, B + 1) if B % d == 0 and d * nt <= row_cap]
    reaching = [d for d in cands if d * nt >= target_rows]
    bt = min(reaching) if reaching else max(cands)
    # Megacore (v7x) fallback: prefer >= 2 batch blocks, but only when each
    # block still keeps >= 512 fused rows.
    if B // bt < 2:
        for d in sorted(cands, reverse=True):
            if B // d >= 2 and d * nt >= 512:
                bt = d
                break
    return bt, nt


# ----------------------------------------------------------------------------
# Wrapper.
# ----------------------------------------------------------------------------
def pointnet_forward(xyz, features, params):
    # xyz is unused by the reference forward (only `features` feeds the net).
    del xyz
    B, N, Cin = features.shape
    repr_dim = params["wt2"].shape[0]

    # ---- pack / pad the point-wise MLP weights (lane-dense, bf16) ----------
    pw_names = ["w1", "w2", "w3", "w4", "w5"]
    pw_weights = []
    cin_pad = Cin                         # layer 1 keeps the raw feature width
    for name in pw_names:
        w = params[name]                                    # (Cout, Cin_real)
        cout_pad = _rup(w.shape[0])
        wp = jnp.zeros((cin_pad, cout_pad), jnp.float32)
        wp = wp.at[:w.shape[1], :w.shape[0]].set(w.T)
        pw_weights.append(wp.astype(jnp.bfloat16))
        cin_pad = cout_pad
    cpool = cin_pad                       # = 1024 * scaling (128-aligned)

    bias_pw = jnp.zeros((len(pw_names), cpool), jnp.float32)
    for i, name in enumerate(["b1", "b2", "b3", "b4", "b5"]):
        b = params[name]
        bias_pw = bias_pw.at[i, :b.shape[0]].set(b)

    # ---- stage 1: fused per-point MLP + online max-pool --------------------
    Bt, Nt = _pick_tiles(B, N, cpool)
    grid = (B // Bt, N // Nt)

    in_specs = [pl.BlockSpec((Bt, Nt, Cin), lambda b, n: (b, n, 0))]
    for w in pw_weights:
        in_specs.append(_resident_spec(w.shape))
    in_specs.append(_resident_spec(bias_pw.shape))

    rows = Bt * Nt
    weight_bytes = sum(int(w.size) * 2 for w in pw_weights)     # single-buffered
    act_bytes = (rows * cpool * 6
                 + rows * max(int(w.shape[0]) for w in pw_weights) * 2)
    footprint = (weight_bytes + int(bias_pw.size) * 4
                 + 2 * Bt * Nt * Cin * 4            # input block (double buffer)
                 + 2 * Bt * cpool * 2               # pooled output block
                 + Bt * cpool * 2                   # max accumulator scratch
                 + act_bytes)
    vmem_pw = int(min(max(int(footprint * 1.5), 24 << 20), 64 << 20))

    g = pl.pallas_call(
        pointwise_kernel,
        out_shape=jax.ShapeDtypeStruct((B, cpool), jnp.bfloat16),
        grid_spec=pltpu.PrefetchScalarGridSpec(
            num_scalar_prefetch=0,
            grid=grid,
            in_specs=in_specs,
            out_specs=pl.BlockSpec((Bt, cpool), lambda b, n: (b, 0)),
            scratch_shapes=[pltpu.VMEM((Bt, cpool), jnp.bfloat16)],
        ),
        compiler_params=pltpu.CompilerParams(
            dimension_semantics=("parallel", "arbitrary"),
            vmem_limit_bytes=vmem_pw,
        ),
    )(features, *pw_weights, bias_pw)

    # ---- stage 2: top head, one tall matmul over all B pooled vectors ------
    wt1 = params["wt1"]                                     # (512s, 1024s)
    wt2 = params["wt2"]                                     # (repr, 512s)
    c1_pad = _rup(wt1.shape[0])
    repr_pad = _rup(repr_dim)

    wt1_p = jnp.zeros((cpool, c1_pad), jnp.float32)
    wt1_p = wt1_p.at[:wt1.shape[1], :wt1.shape[0]].set(wt1.T).astype(jnp.bfloat16)
    wt2_p = jnp.zeros((c1_pad, repr_pad), jnp.float32)
    wt2_p = wt2_p.at[:wt2.shape[1], :wt2.shape[0]].set(wt2.T).astype(jnp.bfloat16)

    bias_head = jnp.zeros((2, max(c1_pad, repr_pad)), jnp.float32)
    bias_head = bias_head.at[0, :params["bt1"].shape[0]].set(params["bt1"])
    bias_head = bias_head.at[1, :params["bt2"].shape[0]].set(params["bt2"])

    Bh = 1
    for cand in range(1, B + 1):
        if B % cand == 0 and cand <= 512:
            Bh = cand

    head_footprint = (int(wt1_p.size) * 2 + int(wt2_p.size) * 2
                      + int(bias_head.size) * 4
                      + 2 * Bh * cpool * 2 + 2 * Bh * repr_pad * 4
                      + Bh * c1_pad * 6)
    vmem_head = int(min(max(int(head_footprint * 1.5), 16 << 20), 64 << 20))

    out = pl.pallas_call(
        head_kernel,
        out_shape=jax.ShapeDtypeStruct((B, repr_pad), jnp.float32),
        grid_spec=pltpu.PrefetchScalarGridSpec(
            num_scalar_prefetch=0,
            grid=(B // Bh,),
            in_specs=[pl.BlockSpec((Bh, cpool), lambda i: (i, 0)),
                      _resident_spec(wt1_p.shape),
                      _resident_spec(wt2_p.shape),
                      _resident_spec(bias_head.shape)],
            out_specs=pl.BlockSpec((Bh, repr_pad), lambda i: (i, 0)),
        ),
        compiler_params=pltpu.CompilerParams(
            dimension_semantics=("parallel",),
            vmem_limit_bytes=vmem_head,
        ),
    )(g, wt1_p, wt2_p, bias_head)

    # Drop the zero-padded repr columns.
    return out[:, :repr_dim]


# ----------------------------------------------------------------------------
# Synthetic params + plain-JAX reference.
# ----------------------------------------------------------------------------
def init_params(key, in_dim, repr_dim, scaling):
    """Deterministic synthetic weights.  Conv1d(k=1) weight (Cout, Cin, 1) is
    stored squeezed as (Cout, Cin); Linear weight is (Cout, Cin)."""
    dims = {
        "w1": (64, in_dim),            "w2": (64, 64),
        "w3": (64 * scaling, 64),      "w4": (128 * scaling, 64 * scaling),
        "w5": (1024 * scaling, 128 * scaling),
        "wt1": (512 * scaling, 1024 * scaling),
        "wt2": (repr_dim, 512 * scaling),
    }
    params = {}
    for i, (name, shape) in enumerate(dims.items()):
        k = jax.random.fold_in(key, i)
        params[name] = (jax.random.normal(k, shape, jnp.float32) * 0.05)
        params["b" + name[1:]] = (
            jax.random.normal(jax.random.fold_in(k, 1), (shape[0],), jnp.float32) * 0.01)
    return params


def pointnet_reference(features, params):
    """Plain-JAX reference with the same numerics policy as the kernels
    (bf16 matmul operands, f32 accumulation, f32 bias/ReLU)."""
    def layer(h, w, b, relu=True):
        y = jnp.dot(h.astype(jnp.bfloat16), w.T.astype(jnp.bfloat16),
                    preferred_element_type=jnp.float32) + b
        return jnp.maximum(y, 0.0) if relu else y

    h = features
    for n in ["1", "2", "3", "4", "5"]:
        h = layer(h, params["w" + n], params["b" + n])
    g = jnp.max(h, axis=1)                       # AdaptiveMaxPool1d(1)
    t = layer(g, params["wt1"], params["bt1"])
    return layer(t, params["wt2"], params["bt2"], relu=False)


if __name__ == "__main__":
    B, N, in_dim, repr_dim, scaling = 2, 64, 4, 16, 1

    key = jax.random.PRNGKey(0)
    k_xyz, k_feat, k_par = jax.random.split(key, 3)
    xyz = jax.random.normal(k_xyz, (B, N, 3), jnp.float32)
    features = jax.random.normal(k_feat, (B, N, in_dim), jnp.float32)
    params = init_params(k_par, in_dim, repr_dim, scaling)

    out = pointnet_forward(xyz, features, params)
    out = jax.block_until_ready(out)

    ref = pointnet_reference(features, params)
    assert out.shape == (B, repr_dim)
    assert jnp.allclose(out, ref, atol=1e-3, rtol=1e-3), (
        float(jnp.max(jnp.abs(out - ref))))

    print("KERNEL_OK")
</pallas_src>

<mosaic_0001>
module attributes {stable_mosaic.version = 11 : i64} {
  func.func @pointwise_kernel(%arg0: i32, %arg1: i32, %arg2: memref<2x64x4xf32, #tpu.memory_space<vmem>>, %arg3: memref<4x128xbf16, #tpu.memory_space<vmem>>, %arg4: memref<128x128xbf16, #tpu.memory_space<vmem>>, %arg5: memref<128x128xbf16, #tpu.memory_space<vmem>>, %arg6: memref<128x128xbf16, #tpu.memory_space<vmem>>, %arg7: memref<128x1024xbf16, #tpu.memory_space<vmem>>, %arg8: memref<5x1024xf32, #tpu.memory_space<vmem>>, %arg9: memref<2x1024xbf16, #tpu.memory_space<vmem>>, %arg10: memref<2x1024xbf16, #tpu.memory_space<vmem>>) attributes {dimension_semantics = [#tpu.dimension_semantics<parallel>, #tpu.dimension_semantics<arbitrary>], iteration_bounds = array<i64: 1, 1>, scalar_prefetch = 0 : i64, scratch_operands = 1 : i64, tpu.core_type = #tpu.core_type<tc>, window_params = [{transform_indices = @transform_0, window_bounds = array<i64: 2, 64, 4>}, {pipeline_mode = #tpu.pipeline_mode<synchronous>, transform_indices = @transform_1, window_bounds = array<i64: 4, 128>}, {pipeline_mode = #tpu.pipeline_mode<synchronous>, transform_indices = @transform_2, window_bounds = array<i64: 128, 128>}, {pipeline_mode = #tpu.pipeline_mode<synchronous>, transform_indices = @transform_3, window_bounds = array<i64: 128, 128>}, {pipeline_mode = #tpu.pipeline_mode<synchronous>, transform_indices = @transform_4, window_bounds = array<i64: 128, 128>}, {pipeline_mode = #tpu.pipeline_mode<synchronous>, transform_indices = @transform_5, window_bounds = array<i64: 128, 1024>}, {pipeline_mode = #tpu.pipeline_mode<synchronous>, transform_indices = @transform_6, window_bounds = array<i64: 5, 1024>}, {transform_indices = @transform_7, window_bounds = array<i64: 2, 1024>}]} {
    %c0_i32 = arith.constant 0 : i32
    %0 = arith.cmpi eq, %arg1, %c0_i32 : i32
    %1 = arith.extui %0 : i1 to i32
    %c0_i32_0 = arith.constant 0 : i32
    %2 = arith.cmpi ne, %1, %c0_i32_0 : i32
    scf.if %2 {
      %cst_35 = arith.constant 0.000000e+00 : bf16
      %54 = vector.broadcast %cst_35 : bf16 to vector<2x1024xbf16>
      %c0_36 = arith.constant 0 : index
      %c0_37 = arith.constant 0 : index
      %55 = vector.load %arg10[%c0_36, %c0_37] : memref<2x1024xbf16, #tpu.memory_space<vmem>>, vector<2x1024xbf16>
      tpu.vector_store %arg10[%c0_36, %c0_37], %54 {strides = array<i32>} : memref<2x1024xbf16, #tpu.memory_space<vmem>>, vector<2x1024xbf16>,
    } else {
    }
    %c0 = arith.constant 0 : index
    %c0_1 = arith.constant 0 : index
    %c0_2 = arith.constant 0 : index
    %3 = vector.load %arg2[%c0, %c0_1, %c0_2] : memref<2x64x4xf32, #tpu.memory_space<vmem>>, vector<2x64x4xf32>
    %4 = vector.shape_cast %3 : vector<2x64x4xf32> to vector<128x4xf32>
    %5 = arith.truncf %4 : vector<128x4xf32> to vector<128x4xbf16>
    %c0_3 = arith.constant 0 : index
    %c0_4 = arith.constant 0 : index
    %6 = vector.load %arg3[%c0_3, %c0_4] : memref<4x128xbf16, #tpu.memory_space<vmem>>, vector<4x128xbf16>
    %cst = arith.constant dense<0.000000e+00> : vector<128x128xf32>
    %7 = tpu.matmul %5, %6, %cst {dimension_numbers = #tpu.dot_dimension_numbers<[1], [0], [0], [1], [0, 0, 1, 1], [], []>} : vector<128x4xbf16>, vector<4x128xbf16>, vector<128x128xf32> -> vector<128x128xf32>
    %c0_5 = arith.constant 0 : index
    %c0_6 = arith.constant 0 : index
    %8 = vector.load %arg8[%c0_5, %c0_6] : memref<5x1024xf32, #tpu.memory_space<vmem>>, vector<1x128xf32>
    %9 = vector.broadcast %8 : vector<1x128xf32> to vector<128x128xf32>
    %10 = arith.addf %7, %9 : vector<128x128xf32>
    %cst_7 = arith.constant 0.000000e+00 : f32
    %11 = vector.broadcast %cst_7 : f32 to vector<128x128xf32>
    %12 = arith.maximumf %10, %11 : vector<128x128xf32>
    %13 = arith.truncf %12 : vector<128x128xf32> to vector<128x128xbf16>
    %c0_8 = arith.constant 0 : index
    %c0_9 = arith.constant 0 : index
    %14 = vector.load %arg4[%c0_8, %c0_9] : memref<128x128xbf16, #tpu.memory_space<vmem>>, vector<128x128xbf16>
    %cst_10 = arith.constant dense<0.000000e+00> : vector<128x128xf32>
    %15 = tpu.matmul %13, %14, %cst_10 {dimension_numbers = #tpu.dot_dimension_numbers<[1], [0], [0], [1], [0, 0, 1, 1], [], []>} : vector<128x128xbf16>, vector<128x128xbf16>, vector<128x128xf32> -> vector<128x128xf32>
    %c1 = arith.constant 1 : index
    %c0_11 = arith.constant 0 : index
    %16 = vector.load %arg8[%c1, %c0_11] : memref<5x1024xf32, #tpu.memory_space<vmem>>, vector<1x128xf32>
    %17 = vector.broadcast %16 : vector<1x128xf32> to vector<128x128xf32>
    %18 = arith.addf %15, %17 : vector<128x128xf32>
    %cst_12 = arith.constant 0.000000e+00 : f32
    %19 = vector.broadcast %cst_12 : f32 to vector<128x128xf32>
    %20 = arith.maximumf %18, %19 : vector<128x128xf32>
    %21 = arith.truncf %20 : vector<128x128xf32> to vector<128x128xbf16>
    %c0_13 = arith.constant 0 : index
    %c0_14 = arith.constant 0 : index
    %22 = vector.load %arg5[%c0_13, %c0_14] : memref<128x128xbf16, #tpu.memory_space<vmem>>, vector<128x128xbf16>
    %cst_15 = arith.constant dense<0.000000e+00> : vector<128x128xf32>
    %23 = tpu.matmul %21, %22, %cst_15 {dimension_numbers = #tpu.dot_dimension_numbers<[1], [0], [0], [1], [0, 0, 1, 1], [], []>} : vector<128x128xbf16>, vector<128x128xbf16>, vector<128x128xf32> -> vector<128x128xf32>
    %c2 = arith.constant 2 : index
    %c0_16 = arith.constant 0 : index
    %24 = vector.load %arg8[%c2, %c0_16] : memref<5x1024xf32, #tpu.memory_space<vmem>>, vector<1x128xf32>
    %25 = vector.broadcast %24 : vector<1x128xf32> to vector<128x128xf32>
    %26 = arith.addf %23, %25 : vector<128x128xf32>
    %cst_17 = arith.constant 0.000000e+00 : f32
    %27 = vector.broadcast %cst_17 : f32 to vector<128x128xf32>
    %28 = arith.maximumf %26, %27 : vector<128x128xf32>
    %29 = arith.truncf %28 : vector<128x128xf32> to vector<128x128xbf16>
    %c0_18 = arith.constant 0 : index
    %c0_19 = arith.constant 0 : index
    %30 = vector.load %arg6[%c0_18, %c0_19] : memref<128x128xbf16, #tpu.memory_space<vmem>>, vector<128x128xbf16>
    %cst_20 = arith.constant dense<0.000000e+00> : vector<128x128xf32>
    %31 = tpu.matmul %29, %30, %cst_20 {dimension_numbers = #tpu.dot_dimension_numbers<[1], [0], [0], [1], [0, 0, 1, 1], [], []>} : vector<128x128xbf16>, vector<128x128xbf16>, vector<128x128xf32> -> vector<128x128xf32>
    %c3 = arith.constant 3 : index
    %c0_21 = arith.constant 0 : index
    %32 = vector.load %arg8[%c3, %c0_21] : memref<5x1024xf32, #tpu.memory_space<vmem>>, vector<1x128xf32>
    %33 = vector.broadcast %32 : vector<1x128xf32> to vector<128x128xf32>
    %34 = arith.addf %31, %33 : vector<128x128xf32>
    %cst_22 = arith.constant 0.000000e+00 : f32
    %35 = vector.broadcast %cst_22 : f32 to vector<128x128xf32>
    %36 = arith.maximumf %34, %35 : vector<128x128xf32>
    %37 = arith.truncf %36 : vector<128x128xf32> to vector<128x128xbf16>
    %c0_23 = arith.constant 0 : index
    %c0_24 = arith.constant 0 : index
    %38 = vector.load %arg7[%c0_23, %c0_24] : memref<128x1024xbf16, #tpu.memory_space<vmem>>, vector<128x1024xbf16>
    %cst_25 = arith.constant dense<0.000000e+00> : vector<128x1024xf32>
    %39 = tpu.matmul %37, %38, %cst_25 {dimension_numbers = #tpu.dot_dimension_numbers<[1], [0], [0], [1], [0, 0, 1, 1], [], []>} : vector<128x128xbf16>, vector<128x1024xbf16>, vector<128x1024xf32> -> vector<128x1024xf32>
    %c4 = arith.constant 4 : index
    %c0_26 = arith.constant 0 : index
    %40 = vector.load %arg8[%c4, %c0_26] : memref<5x1024xf32, #tpu.memory_space<vmem>>, vector<1x1024xf32>
    %41 = vector.broadcast %40 : vector<1x1024xf32> to vector<128x1024xf32>
    %42 = arith.addf %39, %41 : vector<128x1024xf32>
    %cst_27 = arith.constant 0.000000e+00 : f32
    %43 = vector.broadcast %cst_27 : f32 to vector<128x1024xf32>
    %44 = arith.maximumf %42, %43 : vector<128x1024xf32>
    %45 = arith.truncf %44 : vector<128x1024xf32> to vector<128x1024xbf16>
    %46 = vector.shape_cast %45 : vector<128x1024xbf16> to vector<2x64x1024xbf16>
    %cst_28 = arith.constant dense<0xFF80> : vector<2x1024xbf16>
    %47 = vector.multi_reduction <maximumf>, %46, %cst_28 [1] : vector<2x64x1024xbf16> to vector<2x1024xbf16>
    %c0_29 = arith.constant 0 : index
    %c0_30 = arith.constant 0 : index
    %48 = vector.load %arg10[%c0_29, %c0_30] : memref<2x1024xbf16, #tpu.memory_space<vmem>>, vector<2x1024xbf16>
    %49 = arith.maximumf %48, %47 : vector<2x1024xbf16>
    %c0_31 = arith.constant 0 : index
    %c0_32 = arith.constant 0 : index
    %50 = vector.load %arg10[%c0_31, %c0_32] : memref<2x1024xbf16, #tpu.memory_space<vmem>>, vector<2x1024xbf16>
    tpu.vector_store %arg10[%c0_31, %c0_32], %49 {strides = array<i32>} : memref<2x1024xbf16, #tpu.memory_space<vmem>>, vector<2x1024xbf16>,
    %c0_i32_33 = arith.constant 0 : i32
    %51 = arith.cmpi eq, %arg1, %c0_i32_33 : i32
    %52 = arith.extui %51 : i1 to i32
    %c0_i32_34 = arith.constant 0 : i32
    %53 = arith.cmpi ne, %52, %c0_i32_34 : i32
    scf.if %53 {
      %c0_35 = arith.constant 0 : index
      %c0_36 = arith.constant 0 : index
      %54 = vector.load %arg10[%c0_35, %c0_36] : memref<2x1024xbf16, #tpu.memory_space<vmem>>, vector<2x1024xbf16>
      %c0_37 = arith.constant 0 : index
      %c0_38 = arith.constant 0 : index
      %55 = vector.load %arg9[%c0_37, %c0_38] : memref<2x1024xbf16, #tpu.memory_space<vmem>>, vector<2x1024xbf16>
      tpu.vector_store %arg9[%c0_37, %c0_38], %54 {strides = array<i32>} : memref<2x1024xbf16, #tpu.memory_space<vmem>>, vector<2x1024xbf16>,
    } else {
    }
    return
  }
  func.func @transform_0(%arg0: i32, %arg1: i32) -> (i32, i32, i32) {
    %c0_i32 = arith.constant 0 : i32
    %c0_i32_0 = arith.constant 0 : i32
    return %arg0, %arg1, %c0_i32 : i32, i32, i32
  }
  func.func @transform_1(%arg0: i32, %arg1: i32) -> (i32, i32) {
    %c0_i32 = arith.constant 0 : i32
    %c0_i32_0 = arith.constant 0 : i32
    %c0_i32_1 = arith.constant 0 : i32
    return %c0_i32, %c0_i32_0 : i32, i32
  }
  func.func @transform_2(%arg0: i32, %arg1: i32) -> (i32, i32) {
    %c0_i32 = arith.constant 0 : i32
    %c0_i32_0 = arith.constant 0 : i32
    %c0_i32_1 = arith.constant 0 : i32
    return %c0_i32, %c0_i32_0 : i32, i32
  }
  func.func @transform_3(%arg0: i32, %arg1: i32) -> (i32, i32) {
    %c0_i32 = arith.constant 0 : i32
    %c0_i32_0 = arith.constant 0 : i32
    %c0_i32_1 = arith.constant 0 : i32
    return %c0_i32, %c0_i32_0 : i32, i32
  }
  func.func @transform_4(%arg0: i32, %arg1: i32) -> (i32, i32) {
    %c0_i32 = arith.constant 0 : i32
    %c0_i32_0 = arith.constant 0 : i32
    %c0_i32_1 = arith.constant 0 : i32
    return %c0_i32, %c0_i32_0 : i32, i32
  }
  func.func @transform_5(%arg0: i32, %arg1: i32) -> (i32, i32) {
    %c0_i32 = arith.constant 0 : i32
    %c0_i32_0 = arith.constant 0 : i32
    %c0_i32_1 = arith.constant 0 : i32
    return %c0_i32, %c0_i32_0 : i32, i32
  }
  func.func @transform_6(%arg0: i32, %arg1: i32) -> (i32, i32) {
    %c0_i32 = arith.constant 0 : i32
    %c0_i32_0 = arith.constant 0 : i32
    %c0_i32_1 = arith.constant 0 : i32
    return %c0_i32, %c0_i32_0 : i32, i32
  }
  func.func @transform_7(%arg0: i32, %arg1: i32) -> (i32, i32) {
    %c0_i32 = arith.constant 0 : i32
    %c0_i32_0 = arith.constant 0 : i32
    return %arg0, %c0_i32 : i32, i32
  }
}

</mosaic_0001>

<bundles_post_ra>
// kernel: tpu_custom_call.1
= control target key start
LH: loop header
LB: loop body
LE: loop exit
PB: predicated region body
PF: predicated region fallthrough
CT: control target
= control target key end

     0   :  { %12 = vsyncpa [#allocation4], 0  ;;  %s3196_s0 = inlined_call_operand.vmem [shape: f32[2,64,4], index: 0, kind: input, shape index: {}]   ;;  %s3197_s1 = inlined_call_operand.vmem [shape: bf16[4,128], index: 1, kind: input, shape index: {}]   ;;  %s3198_s2 = inlined_call_operand.vmem [shape: bf16[128,128], index: 2, kind: input, shape index: {}]   ;;  %s3199_s3 = inlined_call_operand.vmem [shape: bf16[128,128], index: 3, kind: input, shape index: {}]   ;;  %s3200_s4 = inlined_call_operand.hbm [shape: bf16[128,128], index: 4, kind: input, shape index: {}]   ;;  %s3201_s5 = inlined_call_operand.hbm [shape: bf16[128,1024], index: 5, kind: input, shape index: {}]   ;;  %s3202_s6 = inlined_call_operand.hbm [shape: f32[5,1024], index: 6, kind: input, shape index: {}]   ;;  %s3203_s7 = inlined_call_operand.hbm [shape: bf16[2,1024], index: 7, kind: output, shape index: {}]  }
   0x1   :  { %13 = vsyncpa [#allocation7], 0  ;;  %s40_s26 = sshll.u32 %s3201_s5, 4  ;;  %s41_s26 = int_to_ptr.hbm [resolvable:$true] %s40_s26 }
   0x2   :  { %14 = vsyncpa [#allocation5], 0  ;;  %s2675_s27 = smov [#allocation6]   ;;  %s27_s8 = sshll.u32 %s3200_s4, 4  ;;  %s28_s8 = int_to_ptr.hbm [resolvable:$true] %s27_s8 }
   0x3   :  { %s42_s28 = sshll.u32 %s2675_s27, 4  ;;  %s2676_s9 = smov 512   ;;  %s43_s28 = int_to_ptr.vmem [resolvable:$true] %s42_s28 }
   0x4   :  { %s2677_s10 = smov 32   ;;  %s2678_s11 = smov [#allocation3]  }
   0x5   :  { %48 = dma.hbm_to_vmem [thread:$0]  %s41_s26, 8192, %s43_s28, [#allocation7], %s2676_s9, %s2676_s9, %s2677_s10  }
   0x6   :  { %s29_s12 = sshll.u32 %s2678_s11, 4  ;;  %s2679_s13 = smov 64   ;;  %s30_s12 = int_to_ptr.vmem [resolvable:$true] %s29_s12 }
   0x7   :  { %s2680_s14 = smov 4   ;;  %s54_s16 = sshll.u32 %s3202_s6, 4  ;;  %s55_s16 = int_to_ptr.hbm [resolvable:$true] %s54_s16 }
   0x8   :  { %35 = dma.hbm_to_vmem [thread:$0]  %s28_s8, 1024, %s30_s12, [#allocation4], %s2679_s13, %s2679_s13, %s2680_s14  }
   0x9   :  { %s2681_s17 = smov [#allocation8]  }
   0xa   :  { %s56_s18 = sshll.u32 %s2681_s17, 4  ;;  %s57_s18 = int_to_ptr.vmem [resolvable:$true] %s56_s18 }
   0xb   :  { %59 = dma.hbm_to_vmem [thread:$0]  %s55_s16, 1024, %s57_s18, [#allocation7]  }
   0xc   :  { %2669 = dma.done.wait [#allocation4], 1024  }
   0xd   :  { %2670 = vsyncadd [#allocation4], 4294966272 }
   0xe   :  { %2671 = dma.done.wait [#allocation7], 9216  }
   0xf   :  { %2672 = vsyncadd [#allocation7], 4294958080  ;;  %vm129_vm0 = vcmask 1041408   ;;  %v102_v0 = vld [vmem:[%s3197_s1] sm:$0x3]  ;;  %v79_v2 = vld [vmem:[%s3196_s0 + $0x8] sm:$0xff] }
  0x10   :  { %v78_v1 = vld [vmem:[%s3196_s0] sm:$0xff]  ;;  %v131_v3 = vsel %vm129_vm0, %v102_v0, 0  ;;  %vm104_vm1 = vcmask 31744   ;;  %v80_v5 = vld [vmem:[%s3196_s0 + $0x10] sm:$0xff]  ;;  %v81_v6 = vld [vmem:[%s3196_s0 + $0x18] sm:$0xff]  ;;  %vm2001_vm2 = vcmask 1045508  }
  0x11   :  { %v94_v4 = vpack.c.bf16 %v79_v2, %v78_v1  ;;  %140 = vmatpush.bf16.msra.mxu0 %v131_v3  ;;  %v95_v7 = vpack.c.bf16 %v81_v6, %v80_v5  ;;  %v82_v8 = vld [vmem:[%s3196_s0 + $0x20] sm:$0xff]  ;;  %v83_v9 = vld [vmem:[%s3196_s0 + $0x28] sm:$0xff]  ;;  %v84_v11 = vld [vmem:[%s3196_s0 + $0x30] sm:$0xff]  ;;  %vm2003_vm3 = vcmask 1043456   ;;  %vm2020_vm4 = vcmask 1041409   ;;  %s2105_s29 = sshll.u32 %s3203_s7, 4  ;;  %s2106_s29 = int_to_ptr.hbm [resolvable:$true] %s2105_s29 }
  0x12   :  { %v96_v10 = vpack.c.bf16 %v83_v9, %v82_v8  ;;  %v85_v12 = vld [vmem:[%s3196_s0 + $0x38] sm:$0xff]  ;;  %v86_v14 = vld [vmem:[%s3196_s0 + $0x40] sm:$0xff]  ;;  %v87_v15 = vld [vmem:[%s3196_s0 + $0x48] sm:$0xff]  ;;  %vm2022_vm5 = vcmask 1043459   ;;  %vm2024_vm6 = vcmask 1045509   ;;  %vm2026_vm7 = vcmask 1047559  }
  0x13   :  { %v97_v13 = vpack.c.bf16 %v85_v12, %v84_v11  ;;  %v98_v16 = vpack.c.bf16 %v87_v15, %v86_v14  ;;  %v2483_v17 = vld [vmem:[%s3198_s2 + $0x38] sm:$0xff]  ;;  %v88_v18 = vld [vmem:[%s3196_s0 + $0x50] sm:$0xff]  ;;  %v2481_v22 = vld [vmem:[%s3198_s2 + $0x28] sm:$0xff]  ;;  %vm2014_vm8 = vcmask 1042434   ;;  %vm2075_vm9 = vcmask 1040384  }
  0x14   :  { %2116 = vmatmul.msk.bf16.vlgmr.msra.gmra.mxu0 %vm104_vm1, %v94_v4  ;;  %271 = vmatpush.bf16.msra.mxu1 %v2483_v17  ;;  %v89_v19 = vld [vmem:[%s3196_s0 + $0x58] sm:$0xff]  ;;  %v2482_v21 = vld [vmem:[%s3198_s2 + $0x30] sm:$0xff]  ;;  %v2480_v23 = vld [vmem:[%s3198_s2 + $0x20] sm:$0xff]  ;;  %vm2015_vm10 = vcmask 1044484   ;;  %vm2017_vm11 = vcmask 1046534  }
  0x15   :  { %v99_v20 = vpack.c.bf16 %v89_v19, %v88_v18  ;;  %v90_v24 = vld [vmem:[%s3196_s0 + $0x60] sm:$0xff]  ;;  %v91_v25 = vld [vmem:[%s3196_s0 + $0x68] sm:$0xff]  ;;  %v2479_v26 = vld [vmem:[%s3198_s2 + $0x18] sm:$0xff] }
  0x16   :  { %v100_v27 = vpack.c.bf16 %v91_v25, %v90_v24  ;;  %v2478_v28 = vld [vmem:[%s3198_s2 + $0x10] sm:$0xff]  ;;  %v2477_v29 = vld [vmem:[%s3198_s2 + $0x8] sm:$0xff]  ;;  %v2476_v30 = vld [vmem:[%s3198_s2] sm:$0xff] }
  0x17   :  { %v92_v31 = vld [vmem:[%s3196_s0 + $0x70] sm:$0xff]  ;;  %v93_v32 = vld [vmem:[%s3196_s0 + $0x78] sm:$0xff]  ;;  %v2817_v35 = vld [vmem:[#allocation8] ss:$0 sm:$0xff] }
  0x18   :  { %272 = vmatpush.bf16.msra.mxu1 %v2482_v21  ;;  %v101_v33 = vpack.c.bf16 %v93_v32, %v92_v31  ;;  %v2490_v14 = vld [vmem:[%s3199_s3 + $0x30] sm:$0xff]  ;;  %v2488_v17 = vld [vmem:[%s3199_s3 + $0x20] sm:$0xff]  ;;  %v2487_v21 = vld [vmem:[%s3199_s3 + $0x18] sm:$0xff] }
  0x19   :  { %v2486_v25 = vld [vmem:[%s3199_s3 + $0x10] sm:$0xff] }
  0x1c   :  { %273 = vmatpush.bf16.msra.mxu1 %v2481_v22 }
  0x20   :  { %274 = vmatpush.bf16.msra.mxu1 %v2480_v23 }
  0x24   :  { %2117 = vmatmul.msk.bf16.gmra.mxu0 %vm104_vm1, %v95_v7  ;;  %275 = vmatpush.bf16.msra.mxu1 %v2479_v26 }
  0x28   :  { %276 = vmatpush.bf16.msra.mxu1 %v2478_v28  ;;  %v2484_v28 = vld [vmem:[%s3199_s3] sm:$0xff] }
  0x2c   :  { %277 = vmatpush.bf16.msra.mxu1 %v2477_v29 }
  0x30   :  { %278 = vmatpush.bf16.msra.mxu1 %v2476_v30 }
  0x34   :  { %2118 = vmatmul.msk.bf16.gmra.mxu0 %vm104_vm1, %v96_v10  ;;  %v2491_v10 = vld [vmem:[%s3199_s3 + $0x38] sm:$0xff] }
  0x35   :  { %409 = vmatpush.bf16.msra.mxu2 %v2491_v10 }
  0x39   :  { %410 = vmatpush.bf16.msra.mxu2 %v2490_v14  ;;  %v2499_v14 = vld [vmem:[#allocation3 + $0x38] sm:$0xff] }
  0x3a   :  { %547 = vmatpush.bf16.msra.mxu3 %v2499_v14 }
  0x44   :  { %2119 = vmatmul.msk.bf16.gmra.mxu0 %vm104_vm1, %v97_v13 }
  0x54   :  { %2120 = vmatmul.msk.bf16.gmra.mxu0 %vm104_vm1, %v98_v16  ;;  %v2489_v16 = vld [vmem:[%s3199_s3 + $0x28] sm:$0xff] }
  0x55   :  { %411 = vmatpush.bf16.msra.mxu2 %v2489_v16  ;;  %v2498_v16 = vld [vmem:[#allocation3 + $0x30] sm:$0xff] }
  0x56   :  { %548 = vmatpush.bf16.msra.mxu3 %v2498_v16  ;;  %v2392_v16 = vld [vmem:[#allocation6 + $0x168] sm:$0xf0] }
  0x59   :  { %412 = vmatpush.bf16.msra.mxu2 %v2488_v17  ;;  %v2497_v17 = vld [vmem:[#allocation3 + $0x28] sm:$0xff] }
  0x5a   :  { %549 = vmatpush.bf16.msra.mxu3 %v2497_v17  ;;  %v2382_v17 = vld [vmem:[#allocation6 + $0x140] sm:$0xf] }
  0x5d   :  { %413 = vmatpush.bf16.msra.mxu2 %v2487_v21  ;;  %v2496_v21 = vld [vmem:[#allocation3 + $0x20] sm:$0xff] }
  0x5e   :  { %550 = vmatpush.bf16.msra.mxu3 %v2496_v21  ;;  %v2384_v21 = vld [vmem:[#allocation6 + $0x160] sm:$0xf0] }
  0x61   :  { %414 = vmatpush.bf16.msra.mxu2 %v2486_v25 }
  0x64   :  { %2121 = vmatmul.msk.bf16.gmra.mxu0 %vm104_vm1, %v99_v20 }
  0x74   :  { %2122 = vmatmul.msk.bf16.gmra.mxu0 %vm104_vm1, %v100_v27  ;;  %v2485_v27 = vld [vmem:[%s3199_s3 + $0x8] sm:$0xff]  ;;  %s2683_s3 = smov [#allocation9]  }
  0x75   :  { %415 = vmatpush.bf16.msra.mxu2 %v2485_v27  ;;  %v2494_v27 = vld [vmem:[#allocation3 + $0x10] sm:$0xff]  ;;  %s2103_s26 = sshll.u32 %s2683_s3, 4  ;;  %s2104_s26 = int_to_ptr.vmem [resolvable:$true] %s2103_s26 }
  0x79   :  { %416 = vmatpush.bf16.msra.mxu2 %v2484_v28 }
  0x84   :  { %2123 = vmatmul.msk.bf16.gmra.mxu0 %vm104_vm1, %v101_v33 }
  0x91   :  { %v142_v34 = vpop.f32.mrf.mxu0 }
  0x92   :  { %v143_v36 = vadd.f32 %v142_v34, %v2817_v35 }
  0x94   :  { %v182_v39 = vmax.f32 %v143_v36, 0.0 }
  0x99   :  { %v144_v37 = vpop.f32.mrf.mxu0 }
  0x9a   :  { %v145_v38 = vadd.f32 %v144_v37, %v2817_v35  ;;  %v2859_v37 = vld [vmem:[#allocation8 + $0x1] ss:$0 sm:$0xff] }
  0x9c   :  { %v183_v40 = vmax.f32 %v145_v38, 0.0 }
  0x9e   :  { %v198_v41 = vpack.c.bf16 %v183_v40, %v182_v39 }
  0xa0   :  { %279 = vmatmul.bf16.vlgmr.msra.gmra.mxu1 %v198_v41 }
  0xa1   :  { %v147_v42 = vpop.f32.mrf.mxu0 }
  0xa2   :  { %v148_v43 = vadd.f32 %v147_v42, %v2817_v35 }
  0xa4   :  { %v184_v46 = vmax.f32 %v148_v43, 0.0 }
  0xa9   :  { %v149_v44 = vpop.f32.mrf.mxu0 }
  0xaa   :  { %v150_v45 = vadd.f32 %v149_v44, %v2817_v35 }
  0xac   :  { %v185_v47 = vmax.f32 %v150_v45, 0.0 }
  0xae   :  { %v199_v48 = vpack.c.bf16 %v185_v47, %v184_v46 }
  0xb0   :  { %284 = vmatmul.bf16.gmra.mxu1 %v199_v48 }
  0xb1   :  { %v152_v49 = vpop.f32.mrf.mxu0 }
  0xb2   :  { %v153_v50 = vadd.f32 %v152_v49, %v2817_v35 }
  0xb4   :  { %v186_v53 = vmax.f32 %v153_v50, 0.0 }
  0xb9   :  { %v154_v51 = vpop.f32.mrf.mxu0 }
  0xba   :  { %v155_v52 = vadd.f32 %v154_v51, %v2817_v35 }
  0xbc   :  { %v187_v54 = vmax.f32 %v155_v52, 0.0 }
  0xbe   :  { %v200_v55 = vpack.c.bf16 %v187_v54, %v186_v53 }
  0xc0   :  { %289 = vmatmul.bf16.gmra.mxu1 %v200_v55 }
  0xc1   :  { %v157_v56 = vpop.f32.mrf.mxu0 }
  0xc2   :  { %v158_v57 = vadd.f32 %v157_v56, %v2817_v35 }
  0xc4   :  { %v188_v60 = vmax.f32 %v158_v57, 0.0 }
  0xc9   :  { %v159_v58 = vpop.f32.mrf.mxu0 }
  0xca   :  { %v160_v59 = vadd.f32 %v159_v58, %v2817_v35 }
  0xcc   :  { %v189_v61 = vmax.f32 %v160_v59, 0.0 }
  0xce   :  { %v201_v62 = vpack.c.bf16 %v189_v61, %v188_v60 }
  0xd0   :  { %294 = vmatmul.bf16.gmra.mxu1 %v201_v62 }
  0xd1   :  { %v162_v63 = vpop.f32.mrf.mxu0 }
  0xd2   :  { %v163_v0 = vadd.f32 %v162_v63, %v2817_v35 }
  0xd4   :  { %v190_v3 = vmax.f32 %v163_v0, 0.0 }
  0xd9   :  { %v164_v1 = vpop.f32.mrf.mxu0 }
  0xda   :  { %v165_v2 = vadd.f32 %v164_v1, %v2817_v35 }
  0xdc   :  { %v191_v4 = vmax.f32 %v165_v2, 0.0 }
  0xde   :  { %v202_v5 = vpack.c.bf16 %v191_v4, %v190_v3 }
  0xe0   :  { %299 = vmatmul.bf16.gmra.mxu1 %v202_v5 }
  0xe1   :  { %v167_v6 = vpop.f32.mrf.mxu0 }
  0xe2   :  { %v168_v7 = vadd.f32 %v167_v6, %v2817_v35 }
  0xe4   :  { %v192_v11 = vmax.f32 %v168_v7, 0.0 }
  0xe9   :  { %v169_v8 = vpop.f32.mrf.mxu0 }
  0xea   :  { %v170_v9 = vadd.f32 %v169_v8, %v2817_v35 }
  0xec   :  { %v193_v12 = vmax.f32 %v170_v9, 0.0 }
  0xee   :  { %v203_v13 = vpack.c.bf16 %v193_v12, %v192_v11 }
  0xf0   :  { %304 = vmatmul.bf16.gmra.mxu1 %v203_v13 }
  0xf1   :  { %v172_v15 = vpop.f32.mrf.mxu0 }
  0xf2   :  { %v173_v18 = vadd.f32 %v172_v15, %v2817_v35 }
  0xf4   :  { %v194_v22 = vmax.f32 %v173_v18, 0.0 }
  0xf9   :  { %v174_v19 = vpop.f32.mrf.mxu0 }
  0xfa   :  { %v175_v20 = vadd.f32 %v174_v19, %v2817_v35 }
  0xfc   :  { %v195_v23 = vmax.f32 %v175_v20, 0.0 }
  0xfe   :  { %v204_v24 = vpack.c.bf16 %v195_v23, %v194_v22 }
 0x100   :  { %309 = vmatmul.bf16.gmra.mxu1 %v204_v24 }
 0x101   :  { %v177_v26 = vpop.f32.mrf.mxu0 }
 0x102   :  { %v178_v29 = vadd.f32 %v177_v26, %v2817_v35  ;;  %v2495_v26 = vld [vmem:[#allocation3 + $0x18] sm:$0xff] }
 0x103   :  { %551 = vmatpush.bf16.msra.mxu3 %v2495_v26 }
 0x104   :  { %v196_v32 = vmax.f32 %v178_v29, 0.0 }
 0x107   :  { %552 = vmatpush.bf16.msra.mxu3 %v2494_v27 }
 0x109   :  { %v179_v30 = vpop.f32.mrf.mxu0 }
 0x10a   :  { %v180_v31 = vadd.f32 %v179_v30, %v2817_v35  ;;  %v2493_v30 = vld [vmem:[#allocation3 + $0x8] sm:$0xff] }
 0x10b   :  { %553 = vmatpush.bf16.msra.mxu3 %v2493_v30 }
 0x10c   :  { %v197_v33 = vmax.f32 %v180_v31, 0.0 }
 0x10e   :  { %v205_v34 = vpack.c.bf16 %v197_v33, %v196_v32 }
 0x110   :  { %314 = vmatmul.bf16.gmra.mxu1 %v205_v34  ;;  %v2492_v34 = vld [vmem:[#allocation3] sm:$0xff] }
 0x111   :  { %554 = vmatpush.bf16.msra.mxu3 %v2492_v34  ;;  %v2533_v34 = vld [vmem:[#allocation6 + $0x10c] sm:$0xf] }
 0x11d   :  { %v280_v36 = vpop.f32.mrf.mxu1 }
 0x11e   :  { %v281_v38 = vadd.f32 %v280_v36, %v2859_v37 }
 0x120   :  { %v320_v41 = vmax.f32 %v281_v38, 0.0 }
 0x125   :  { %v282_v39 = vpop.f32.mrf.mxu1 }
 0x126   :  { %v283_v40 = vadd.f32 %v282_v39, %v2859_v37  ;;  %v2877_v39 = vld [vmem:[#allocation8 + $0x2] ss:$0 sm:$0xff] }
 0x128   :  { %v321_v42 = vmax.f32 %v283_v40, 0.0  ;;  %v2454_v40 = vld [vmem:[#allocation6 + $0x1c8] sm:$0xf] }
 0x12a   :  { %v336_v43 = vpack.c.bf16 %v321_v42, %v320_v41  ;;  %v2561_v41 = vld [vmem:[#allocation6 + $0x1e4] sm:$0xf0] }
 0x12b   :  { %v2455_v42 = vor.u32 %v2561_v41, %v2454_v40  ;;  %v2536_v41 = vld [vmem:[#allocation6 + $0x11c] sm:$0xf0] }
 0x12c   :  { %417 = vmatmul.bf16.vlgmr.msra.gmra.mxu2 %v336_v43  ;;  %v2557_v43 = vld [vmem:[#allocation6 + $0x1cc] sm:$0xf] }
 0x12d   :  { %v285_v44 = vpop.f32.mrf.mxu1  ;;  %1123 = vmatpush.bf16.msrb.mxu2 %v2455_v42  ;;  %v2532_v42 = vld [vmem:[#allocation6 + $0x104] sm:$0xf] }
 0x12e   :  { %v286_v45 = vadd.f32 %v285_v44, %v2859_v37  ;;  %v2456_v44 = vld [vmem:[#allocation6 + $0x1e8] sm:$0xf0] }
 0x130   :  { %v322_v47 = vmax.f32 %v286_v45, 0.0  ;;  %v2446_v45 = vld [vmem:[#allocation6 + $0x1c0] sm:$0xf] }
 0x135   :  { %v287_v35 = vpop.f32.mrf.mxu1 }
 0x136   :  { %v288_v46 = vadd.f32 %v287_v35, %v2859_v37  ;;  %v2459_v35 = vor.u32 %v2557_v43, %v2456_v44  ;;  %v2352_v43 = vld [vmem:[#allocation6 + $0x120] sm:$0xf0] }
 0x138   :  { %v323_v48 = vmax.f32 %v288_v46, 0.0  ;;  %v2560_v46 = vld [vmem:[#allocation6 + $0x1dc] sm:$0xf0]  ;;  %1172 = vmatpush.bf16.msrb.mxu3 %v2459_v35 }
 0x13a   :  { %v337_v49 = vpack.c.bf16 %v323_v48, %v322_v47  ;;  %v2556_v47 = vld [vmem:[#allocation6 + $0x1c4] sm:$0xf]  ;;  %v2447_v48 = vor.u32 %v2560_v46, %v2446_v45  ;;  %v2355_v45 = vor.u32 %v2532_v42, %v2352_v43  ;;  %v2501_v42 = vld [vmem:[#allocation6 + $0xc] sm:$0xf] }
 0x13b   :  { %v2232_v43 = vld [vmem:[#allocation6 + $0x28] sm:$0xf0] }
 0x13c   :  { %422 = vmatmul.bf16.gmra.mxu2 %v337_v49  ;;  %1025 = vmatpush.bf16.msrb.mxu0 %v2447_v48 }
 0x13d   :  { %v290_v50 = vpop.f32.mrf.mxu1 }
 0x13e   :  { %v291_v51 = vadd.f32 %v290_v50, %v2859_v37 }
 0x140   :  { %v324_v54 = vmax.f32 %v291_v51, 0.0 }
 0x145   :  { %v292_v52 = vpop.f32.mrf.mxu1 }
 0x146   :  { %v293_v53 = vadd.f32 %v292_v52, %v2859_v37 }
 0x148   :  { %v325_v55 = vmax.f32 %v293_v53, 0.0 }
 0x14a   :  { %v338_v56 = vpack.c.bf16 %v325_v55, %v324_v54 }
 0x14c   :  { %427 = vmatmul.bf16.gmra.mxu2 %v338_v56 }
 0x14d   :  { %v295_v57 = vpop.f32.mrf.mxu1 }
 0x14e   :  { %v296_v58 = vadd.f32 %v295_v57, %v2859_v37  ;;  %v2422_v57 = vld [vmem:[#allocation6 + $0x188] sm:$0xf] }
 0x150   :  { %v326_v61 = vmax.f32 %v296_v58, 0.0  ;;  %v2553_v58 = vld [vmem:[#allocation6 + $0x1a4] sm:$0xf0] }
 0x155   :  { %v297_v59 = vpop.f32.mrf.mxu1 }
 0x156   :  { %v298_v60 = vadd.f32 %v297_v59, %v2859_v37  ;;  %v2423_v59 = vor.u32 %v2553_v58, %v2422_v57  ;;  %v2528_v58 = vld [vmem:[#allocation6 + $0xdc] sm:$0xf0] }
 0x158   :  { %v327_v62 = vmax.f32 %v298_v60, 0.0  ;;  %v2549_v60 = vld [vmem:[#allocation6 + $0x18c] sm:$0xf]  ;;  %1124 = vmatpush.bf16.msrb.mxu2 %v2423_v59  ;;  %v2524_v59 = vld [vmem:[#allocation6 + $0xc4] sm:$0xf] }
 0x15a   :  { %v339_v63 = vpack.c.bf16 %v327_v62, %v326_v61  ;;  %v2424_v61 = vld [vmem:[#allocation6 + $0x1a8] sm:$0xf0]  ;;  %v2414_v62 = vld [vmem:[#allocation6 + $0x180] sm:$0xf] }
 0x15c   :  { %432 = vmatmul.bf16.gmra.mxu2 %v339_v63  ;;  %v2427_v63 = vor.u32 %v2549_v60, %v2424_v61  ;;  %v2320_v60 = vld [vmem:[#allocation6 + $0xe0] sm:$0xf0] }
 0x15d   :  { %v300_v0 = vpop.f32.mrf.mxu1 }
 0x15e   :  { %v301_v1 = vadd.f32 %v300_v0, %v2859_v37  ;;  %v2552_v0 = vld [vmem:[#allocation6 + $0x19c] sm:$0xf0]  ;;  %1173 = vmatpush.bf16.msrb.mxu3 %v2427_v63 }
 0x160   :  { %v328_v4 = vmax.f32 %v301_v1, 0.0  ;;  %v2548_v1 = vld [vmem:[#allocation6 + $0x184] sm:$0xf] }
 0x165   :  { %v302_v2 = vpop.f32.mrf.mxu1 }
 0x166   :  { %v303_v3 = vadd.f32 %v302_v2, %v2859_v37  ;;  %v2416_v2 = vld [vmem:[#allocation6 + $0x1a0] sm:$0xf0] }
 0x168   :  { %v329_v5 = vmax.f32 %v303_v3, 0.0  ;;  %v2415_v3 = vor.u32 %v2552_v0, %v2414_v62  ;;  %v2323_v62 = vor.u32 %v2524_v59, %v2320_v60 }
 0x16a   :  { %v340_v6 = vpack.c.bf16 %v329_v5, %v328_v4  ;;  %v2419_v4 = vor.u32 %v2548_v1, %v2416_v2  ;;  %1026 = vmatpush.bf16.msrb.mxu0 %v2415_v3 }
 0x16c   :  { %437 = vmatmul.bf16.gmra.mxu2 %v340_v6 }
 0x16d   :  { %v305_v7 = vpop.f32.mrf.mxu1 }
 0x16e   :  { %v306_v8 = vadd.f32 %v305_v7, %v2859_v37 }
 0x170   :  { %v330_v11 = vmax.f32 %v306_v8, 0.0 }
 0x175   :  { %v307_v9 = vpop.f32.mrf.mxu1 }
 0x176   :  { %v308_v10 = vadd.f32 %v307_v9, %v2859_v37 }
 0x178   :  { %v331_v12 = vmax.f32 %v308_v10, 0.0 }
 0x17a   :  { %v341_v13 = vpack.c.bf16 %v331_v12, %v330_v11  ;;  %v2390_v12 = vld [vmem:[#allocation6 + $0x148] sm:$0xf] }
 0x17c   :  { %442 = vmatmul.bf16.gmra.mxu2 %v341_v13  ;;  %v2545_v13 = vld [vmem:[#allocation6 + $0x164] sm:$0xf0] }
 0x17d   :  { %v310_v15 = vpop.f32.mrf.mxu1  ;;  %v2391_v14 = vor.u32 %v2545_v13, %v2390_v12  ;;  %v2520_v13 = vld [vmem:[#allocation6 + $0x9c] sm:$0xf0] }
 0x17e   :  { %v311_v18 = vadd.f32 %v310_v15, %v2859_v37  ;;  %v2541_v15 = vld [vmem:[#allocation6 + $0x14c] sm:$0xf] }
 0x17f   :  { %1125 = vmatpush.bf16.msrb.mxu2 %v2391_v14  ;;  %v2516_v14 = vld [vmem:[#allocation6 + $0x84] sm:$0xf] }
 0x180   :  { %v332_v22 = vmax.f32 %v311_v18, 0.0  ;;  %v2395_v18 = vor.u32 %v2541_v15, %v2392_v16  ;;  %v2288_v15 = vld [vmem:[#allocation6 + $0xa0] sm:$0xf0] }
 0x182   :  { %1174 = vmatpush.bf16.msrb.mxu3 %v2395_v18 }
 0x185   :  { %v312_v19 = vpop.f32.mrf.mxu1 }
 0x186   :  { %v313_v20 = vadd.f32 %v312_v19, %v2859_v37  ;;  %v2544_v19 = vld [vmem:[#allocation6 + $0x15c] sm:$0xf0] }
 0x188   :  { %v333_v23 = vmax.f32 %v313_v20, 0.0  ;;  %v2540_v20 = vld [vmem:[#allocation6 + $0x144] sm:$0xf] }
 0x18a   :  { %v342_v24 = vpack.c.bf16 %v333_v23, %v332_v22  ;;  %v2383_v22 = vor.u32 %v2544_v19, %v2382_v17  ;;  %v2387_v23 = vor.u32 %v2540_v20, %v2384_v21  ;;  %v2291_v17 = vor.u32 %v2516_v14, %v2288_v15  ;;  %v2440_v15 = vld [vmem:[#allocation6 + $0x1b8] sm:$0xf0] }
 0x18c   :  { %447 = vmatmul.bf16.gmra.mxu2 %v342_v24  ;;  %1027 = vmatpush.bf16.msrb.mxu0 %v2383_v22 }
 0x18d   :  { %v315_v25 = vpop.f32.mrf.mxu1 }
 0x18e   :  { %v316_v28 = vadd.f32 %v315_v25, %v2859_v37 }
 0x190   :  { %v334_v32 = vmax.f32 %v316_v28, 0.0 }
 0x195   :  { %v317_v29 = vpop.f32.mrf.mxu1 }
 0x196   :  { %v318_v31 = vadd.f32 %v317_v29, %v2859_v37  ;;  %v2448_v37 = vld [vmem:[#allocation6 + $0x1e0] sm:$0xf0] }
 0x197   :  { %v2451_v49 = vor.u32 %v2556_v47, %v2448_v37 }
 0x198   :  { %v335_v33 = vmax.f32 %v318_v31, 0.0  ;;  %v2358_v31 = vld [vmem:[#allocation6 + $0x108] sm:$0xf] }
 0x199   :  { %1074 = vmatpush.bf16.msrb.mxu1 %v2451_v49 }
 0x19a   :  { %v343_v36 = vpack.c.bf16 %v335_v33, %v334_v32  ;;  %v2537_v32 = vld [vmem:[#allocation6 + $0x124] sm:$0xf0] }
 0x19b   :  { %v2359_v33 = vor.u32 %v2537_v32, %v2358_v31  ;;  %v2512_v31 = vld [vmem:[#allocation6 + $0x5c] sm:$0xf0] }
 0x19c   :  { %452 = vmatmul.bf16.gmra.mxu2 %v343_v36  ;;  %v2360_v36 = vld [vmem:[#allocation6 + $0x128] sm:$0xf0] }
 0x19d   :  { %1075 = vmatpush.bf16.msrb.mxu1 %v2419_v4  ;;  %v2363_v40 = vor.u32 %v2533_v34, %v2360_v36  ;;  %1126 = vmatpush.bf16.msrb.mxu2 %v2359_v33  ;;  %v2508_v34 = vld [vmem:[#allocation6 + $0x44] sm:$0xf] }
 0x19e   :  { %v2256_v36 = vld [vmem:[#allocation6 + $0x60] sm:$0xf0] }
 0x19f   :  { %1175 = vmatpush.bf16.msrb.mxu3 %v2363_v40  ;;  %v2259_v40 = vor.u32 %v2508_v34, %v2256_v36  ;;  %v2408_v36 = vld [vmem:[#allocation6 + $0x178] sm:$0xf0] }
 0x1a1   :  { %1076 = vmatpush.bf16.msrb.mxu1 %v2387_v23 }
 0x1a5   :  { %1077 = vmatpush.bf16.msrb.mxu1 %v2355_v45  ;;  %v2235_v45 = vor.u32 %v2501_v42, %v2232_v43  ;;  %v2542_v43 = vld [vmem:[#allocation6 + $0x154] sm:$0xf] }
 0x1a9   :  { %1078 = vmatpush.bf16.msrb.mxu1 %v2323_v62 }
 0x1ad   :  { %1079 = vmatpush.bf16.msrb.mxu1 %v2291_v17  ;;  %v2430_v17 = vld [vmem:[#allocation6 + $0x190] sm:$0xf] }
 0x1af   :  { %v418_v38 = vpop.f32.mrf.mxu2 }
 0x1b0   :  { %v419_v50 = vadd.f32 %v418_v38, %v2877_v39  ;;  %v2350_v38 = vld [vmem:[#allocation6 + $0x100] sm:$0xf] }
 0x1b1   :  { %v2351_v44 = vor.u32 %v2536_v41, %v2350_v38  ;;  %v2230_v38 = vld [vmem:[#allocation6 + $0x8] sm:$0xf]  ;;  %1080 = vmatpush.bf16.msrb.mxu1 %v2259_v40  ;;  %v2398_v40 = vld [vmem:[#allocation6 + $0x150] sm:$0xf] }
 0x1b2   :  { %v458_v53 = vmax.f32 %v419_v50, 0.0  ;;  %v2505_v41 = vld [vmem:[#allocation6 + $0x24] sm:$0xf0] }
 0x1b3   :  { %1028 = vmatpush.bf16.msrb.mxu0 %v2351_v44  ;;  %v2231_v44 = vor.u32 %v2505_v41, %v2230_v38  ;;  %v2546_v41 = vld [vmem:[#allocation6 + $0x16c] sm:$0xf0] }
 0x1b4   :  { %v2399_v42 = vor.u32 %v2546_v41, %v2398_v40 }
 0x1b7   :  { %v420_v51 = vpop.f32.mrf.mxu2 }
 0x1b8   :  { %v421_v52 = vadd.f32 %v420_v51, %v2877_v39  ;;  %v2326_v51 = vld [vmem:[#allocation6 + $0xc8] sm:$0xf] }
 0x1ba   :  { %v459_v54 = vmax.f32 %v421_v52, 0.0  ;;  %v2529_v52 = vld [vmem:[#allocation6 + $0xe4] sm:$0xf0] }
 0x1bc   :  { %v474_v55 = vpack.c.bf16 %v459_v54, %v458_v53  ;;  %v2327_v53 = vor.u32 %v2529_v52, %v2326_v51  ;;  %v2525_v54 = vld [vmem:[#allocation6 + $0xcc] sm:$0xf]  ;;  %v2222_v51 = vld [vmem:[#allocation6] sm:$0xf] }
 0x1bd   :  { %v2504_v52 = vld [vmem:[#allocation6 + $0x1c] sm:$0xf0] }
 0x1be   :  { %555 = vmatmul.bf16.vlgmr.msra.gmra.mxu3 %v474_v55  ;;  %v2328_v55 = vld [vmem:[#allocation6 + $0xe8] sm:$0xf0]  ;;  %1127 = vmatpush.bf16.msrb.mxu2 %v2327_v53  ;;  %v2500_v53 = vld [vmem:[#allocation6 + $0x4] sm:$0xf] }
 0x1bf   :  { %v423_v56 = vpop.f32.mrf.mxu2  ;;  %v2331_v57 = vor.u32 %v2525_v54, %v2328_v55  ;;  %v2223_v54 = vor.u32 %v2504_v52, %v2222_v51  ;;  %v2224_v55 = vld [vmem:[#allocation6 + $0x20] sm:$0xf0]  ;;  %v2374_v51 = vld [vmem:[#allocation6 + $0x118] sm:$0xf] }
 0x1c0   :  { %v424_v5 = vadd.f32 %v423_v56, %v2877_v39  ;;  %v2318_v56 = vld [vmem:[#allocation6 + $0xc0] sm:$0xf]  ;;  %v2539_v52 = vld [vmem:[#allocation6 + $0x134] sm:$0xf0] }
 0x1c1   :  { %v2319_v61 = vor.u32 %v2528_v58, %v2318_v56  ;;  %1176 = vmatpush.bf16.msrb.mxu3 %v2331_v57  ;;  %v2227_v57 = vor.u32 %v2500_v53, %v2224_v55  ;;  %v2535_v53 = vld [vmem:[#allocation6 + $0x11c] sm:$0xf] }
 0x1c2   :  { %v460_v8 = vmax.f32 %v424_v5, 0.0  ;;  %v2376_v55 = vld [vmem:[#allocation6 + $0x138] sm:$0xf0] }
 0x1c3   :  { %1029 = vmatpush.bf16.msrb.mxu0 %v2319_v61  ;;  %1081 = vmatpush.bf16.msrb.mxu1 %v2227_v57  ;;  %v2366_v57 = vld [vmem:[#allocation6 + $0x110] sm:$0xf] }
 0x1c7   :  { %v425_v6 = vpop.f32.mrf.mxu2 }
 0x1c8   :  { %v426_v7 = vadd.f32 %v425_v6, %v2877_v39  ;;  %v2294_v6 = vld [vmem:[#allocation6 + $0x88] sm:$0xf] }
 0x1ca   :  { %v461_v9 = vmax.f32 %v426_v7, 0.0  ;;  %v2521_v7 = vld [vmem:[#allocation6 + $0xa4] sm:$0xf0] }
 0x1cc   :  { %v475_v10 = vpack.c.bf16 %v461_v9, %v460_v8  ;;  %v2295_v8 = vor.u32 %v2521_v7, %v2294_v6  ;;  %v2517_v9 = vld [vmem:[#allocation6 + $0x8c] sm:$0xf]  ;;  %v2562_v6 = vld [vmem:[#allocation6 + $0x1ec] sm:$0xf0]  ;;  %v2558_v7 = vld [vmem:[#allocation6 + $0x1d4] sm:$0xf] }
 0x1ce   :  { %560 = vmatmul.bf16.gmra.mxu3 %v475_v10  ;;  %v2296_v10 = vld [vmem:[#allocation6 + $0xa8] sm:$0xf0]  ;;  %1128 = vmatpush.bf16.msrb.mxu2 %v2295_v8 }
 0x1cf   :  { %v428_v11 = vpop.f32.mrf.mxu2  ;;  %v2299_v12 = vor.u32 %v2517_v9, %v2296_v10  ;;  %v2464_v9 = vld [vmem:[#allocation6 + $0x1f0] sm:$0xf0] }
 0x1d0   :  { %v429_v24 = vadd.f32 %v428_v11, %v2877_v39  ;;  %v2286_v11 = vld [vmem:[#allocation6 + $0x80] sm:$0xf]  ;;  %v2467_v10 = vor.u32 %v2558_v7, %v2464_v9  ;;  %v2531_v7 = vld [vmem:[#allocation6 + $0xf4] sm:$0xf0] }
 0x1d1   :  { %v2287_v16 = vor.u32 %v2520_v13, %v2286_v11  ;;  %1177 = vmatpush.bf16.msrb.mxu3 %v2299_v12  ;;  %v2438_v11 = vld [vmem:[#allocation6 + $0x198] sm:$0xf]  ;;  %v2551_v13 = vld [vmem:[#allocation6 + $0x19c] sm:$0xf] }
 0x1d2   :  { %v462_v27 = vmax.f32 %v429_v24, 0.0  ;;  %v2262_v24 = vld [vmem:[#allocation6 + $0x48] sm:$0xf]  ;;  %1270 = vmatpush.bf16.msra.mxu1 %v2467_v10  ;;  %v2555_v12 = vld [vmem:[#allocation6 + $0x1b4] sm:$0xf0] }
 0x1d3   :  { %1030 = vmatpush.bf16.msrb.mxu0 %v2287_v16  ;;  %v2439_v14 = vor.u32 %v2555_v12, %v2438_v11  ;;  %v2443_v16 = vor.u32 %v2551_v13, %v2440_v15  ;;  %v2344_v10 = vld [vmem:[#allocation6 + $0xf8] sm:$0xf0]  ;;  %v2334_v11 = vld [vmem:[#allocation6 + $0xd0] sm:$0xf]  ;;  %v2336_v15 = vld [vmem:[#allocation6 + $0xf0] sm:$0xf0] }
 0x1d4   :  { %v2530_v12 = vld [vmem:[#allocation6 + $0xec] sm:$0xf0] }
 0x1d5   :  { %v2335_v13 = vor.u32 %v2530_v12, %v2334_v11  ;;  %v2502_v11 = vld [vmem:[#allocation6 + $0x14] sm:$0xf] }
 0x1d6   :  { %v2240_v12 = vld [vmem:[#allocation6 + $0x30] sm:$0xf0] }
 0x1d7   :  { %v430_v25 = vpop.f32.mrf.mxu2 }
 0x1d8   :  { %v431_v26 = vadd.f32 %v430_v25, %v2877_v39  ;;  %v2513_v25 = vld [vmem:[#allocation6 + $0x64] sm:$0xf0] }
 0x1da   :  { %v463_v28 = vmax.f32 %v431_v26, 0.0  ;;  %v2509_v26 = vld [vmem:[#allocation6 + $0x4c] sm:$0xf] }
 0x1dc   :  { %v476_v29 = vpack.c.bf16 %v463_v28, %v462_v27  ;;  %v2263_v28 = vor.u32 %v2513_v25, %v2262_v24 }
 0x1de   :  { %565 = vmatmul.bf16.gmra.mxu3 %v476_v29  ;;  %v2264_v29 = vld [vmem:[#allocation6 + $0x68] sm:$0xf0]  ;;  %1129 = vmatpush.bf16.msrb.mxu2 %v2263_v28 }
 0x1df   :  { %v433_v30 = vpop.f32.mrf.mxu2  ;;  %v2267_v32 = vor.u32 %v2509_v26, %v2264_v29 }
 0x1e0   :  { %v434_v35 = vadd.f32 %v433_v30, %v2877_v39  ;;  %v2254_v30 = vld [vmem:[#allocation6 + $0x40] sm:$0xf] }
 0x1e1   :  { %v2255_v33 = vor.u32 %v2512_v31, %v2254_v30  ;;  %1178 = vmatpush.bf16.msrb.mxu3 %v2267_v32  ;;  %v2406_v31 = vld [vmem:[#allocation6 + $0x158] sm:$0xf] }
 0x1e2   :  { %v464_v37 = vmax.f32 %v434_v35, 0.0  ;;  %1130 = vmatpush.bf16.msrb.mxu2 %v2231_v44  ;;  %v2547_v32 = vld [vmem:[#allocation6 + $0x174] sm:$0xf0]  ;;  %v2400_v44 = vld [vmem:[#allocation6 + $0x170] sm:$0xf0] }
 0x1e3   :  { %1031 = vmatpush.bf16.msrb.mxu0 %v2255_v33  ;;  %v2543_v33 = vld [vmem:[#allocation6 + $0x15c] sm:$0xf]  ;;  %v2407_v34 = vor.u32 %v2547_v32, %v2406_v31  ;;  %v2302_v32 = vld [vmem:[#allocation6 + $0x90] sm:$0xf] }
 0x1e4   :  { %v2411_v38 = vor.u32 %v2543_v33, %v2408_v36  ;;  %v2522_v33 = vld [vmem:[#allocation6 + $0xac] sm:$0xf0]  ;;  %v2518_v36 = vld [vmem:[#allocation6 + $0x94] sm:$0xf] }
 0x1e5   :  { %1179 = vmatpush.bf16.msrb.mxu3 %v2235_v45  ;;  %v2403_v45 = vor.u32 %v2542_v43, %v2400_v44 }
 0x1e7   :  { %v435_v46 = vpop.f32.mrf.mxu2  ;;  %1032 = vmatpush.bf16.msrb.mxu0 %v2223_v54  ;;  %v2375_v54 = vor.u32 %v2539_v52, %v2374_v51  ;;  %v2280_v51 = vld [vmem:[#allocation6 + $0x78] sm:$0xf0] }
 0x1e8   :  { %v436_v47 = vadd.f32 %v435_v46, %v2877_v39 }
 0x1ea   :  { %v465_v48 = vmax.f32 %v436_v47, 0.0 }
 0x1ec   :  { %v477_v49 = vpack.c.bf16 %v465_v48, %v464_v37 }
 0x1ee   :  { %570 = vmatmul.bf16.gmra.mxu3 %v477_v49 }
 0x1ef   :  { %v438_v50 = vpop.f32.mrf.mxu2 }
 0x1f0   :  { %v439_v63 = vadd.f32 %v438_v50, %v2877_v39 }
 0x1f2   :  { %v466_v2 = vmax.f32 %v439_v63, 0.0  ;;  %v2470_v63 = vld [vmem:[#allocation6 + $0x1d8] sm:$0xf] }
 0x1f7   :  { %v440_v0 = vpop.f32.mrf.mxu2 }
 0x1f8   :  { %v441_v1 = vadd.f32 %v440_v0, %v2877_v39  ;;  %v2563_v0 = vld [vmem:[#allocation6 + $0x1f4] sm:$0xf0] }
 0x1fa   :  { %v467_v3 = vmax.f32 %v441_v1, 0.0  ;;  %v2559_v1 = vld [vmem:[#allocation6 + $0x1dc] sm:$0xf] }
 0x1fc   :  { %v478_v4 = vpack.c.bf16 %v467_v3, %v466_v2  ;;  %v2471_v2 = vor.u32 %v2563_v0, %v2470_v63  ;;  %v2472_v3 = vld [vmem:[#allocation6 + $0x1f8] sm:$0xf0] }
 0x1fe   :  { %575 = vmatmul.bf16.gmra.mxu3 %v478_v4  ;;  %v2475_v4 = vor.u32 %v2559_v1, %v2472_v3  ;;  %1319 = vmatpush.bf16.msra.mxu2 %v2471_v2 }
 0x1ff   :  { %v443_v5 = vpop.f32.mrf.mxu2 }
 0x200   :  { %v444_v18 = vadd.f32 %v443_v5, %v2877_v39  ;;  %v2462_v5 = vld [vmem:[#allocation6 + $0x1d0] sm:$0xf]  ;;  %1368 = vmatpush.bf16.msra.mxu3 %v2475_v4 }
 0x201   :  { %v2463_v8 = vor.u32 %v2562_v6, %v2462_v5  ;;  %v2342_v6 = vld [vmem:[#allocation6 + $0xd8] sm:$0xf] }
 0x202   :  { %v468_v21 = vmax.f32 %v444_v18, 0.0  ;;  %1320 = vmatpush.bf16.msra.mxu2 %v2439_v14  ;;  %v2554_v18 = vld [vmem:[#allocation6 + $0x1ac] sm:$0xf0]  ;;  %v2343_v9 = vor.u32 %v2531_v7, %v2342_v6  ;;  %v2526_v14 = vld [vmem:[#allocation6 + $0xd4] sm:$0xf] }
 0x203   :  { %1221 = vmatpush.bf16.msra.mxu0 %v2463_v8  ;;  %v2527_v8 = vld [vmem:[#allocation6 + $0xdc] sm:$0xf] }
 0x204   :  { %1369 = vmatpush.bf16.msra.mxu3 %v2443_v16  ;;  %v2339_v16 = vor.u32 %v2526_v14, %v2336_v15  ;;  %v2248_v7 = vld [vmem:[#allocation6 + $0x38] sm:$0xf0] }
 0x206   :  { %1321 = vmatpush.bf16.msra.mxu2 %v2407_v34  ;;  %v2303_v34 = vor.u32 %v2522_v33, %v2302_v32 }
 0x207   :  { %v445_v19 = vpop.f32.mrf.mxu2 }
 0x208   :  { %v446_v20 = vadd.f32 %v445_v19, %v2877_v39  ;;  %v2895_v19 = vld [vmem:[#allocation8 + $0x3] ss:$0 sm:$0xff]  ;;  %1370 = vmatpush.bf16.msra.mxu3 %v2411_v38  ;;  %v2304_v38 = vld [vmem:[#allocation6 + $0xb0] sm:$0xf0] }
 0x209   :  { %v2307_v40 = vor.u32 %v2518_v36, %v2304_v38 }
 0x20a   :  { %v469_v22 = vmax.f32 %v446_v20, 0.0  ;;  %v2431_v20 = vor.u32 %v2554_v18, %v2430_v17  ;;  %1322 = vmatpush.bf16.msra.mxu2 %v2375_v54  ;;  %v2514_v54 = vld [vmem:[#allocation6 + $0x6c] sm:$0xf0] }
 0x20c   :  { %v479_v23 = vpack.c.bf16 %v469_v22, %v468_v21  ;;  %v2550_v21 = vld [vmem:[#allocation6 + $0x194] sm:$0xf]  ;;  %1222 = vmatpush.bf16.msra.mxu0 %v2431_v20 }
 0x20d   :  { %v2432_v22 = vld [vmem:[#allocation6 + $0x1b0] sm:$0xf0] }
 0x20e   :  { %580 = vmatmul.bf16.gmra.mxu3 %v479_v23  ;;  %v2435_v23 = vor.u32 %v2550_v21, %v2432_v22  ;;  %1323 = vmatpush.bf16.msra.mxu2 %v2343_v9  ;;  %v2506_v9 = vld [vmem:[#allocation6 + $0x2c] sm:$0xf0] }
 0x20f   :  { %v448_v27 = vpop.f32.mrf.mxu2 }
 0x210   :  { %v449_v35 = vadd.f32 %v448_v27, %v2877_v39  ;;  %1271 = vmatpush.bf16.msra.mxu1 %v2435_v23  ;;  %1223 = vmatpush.bf16.msra.mxu0 %v2399_v42 }
 0x212   :  { %v470_v37 = vmax.f32 %v449_v35, 0.0 }
 0x214   :  { %1272 = vmatpush.bf16.msra.mxu1 %v2403_v45 }
 0x217   :  { %v450_v46 = vpop.f32.mrf.mxu2 }
 0x218   :  { %v451_v47 = vadd.f32 %v450_v46, %v2877_v39 }
 0x21a   :  { %v471_v48 = vmax.f32 %v451_v47, 0.0 }
 0x21c   :  { %v480_v49 = vpack.c.bf16 %v471_v48, %v470_v37 }
 0x21e   :  { %585 = vmatmul.bf16.gmra.mxu3 %v480_v49 }
 0x21f   :  { %v453_v50 = vpop.f32.mrf.mxu2 }
 0x220   :  { %v454_v56 = vadd.f32 %v453_v50, %v2877_v39 }
 0x222   :  { %v472_v60 = vmax.f32 %v454_v56, 0.0  ;;  %v2379_v56 = vor.u32 %v2535_v53, %v2376_v55  ;;  %v2270_v53 = vld [vmem:[#allocation6 + $0x50] sm:$0xf] }
 0x223   :  { %v2271_v55 = vor.u32 %v2514_v54, %v2270_v53 }
 0x224   :  { %1371 = vmatpush.bf16.msra.mxu3 %v2379_v56  ;;  %v2510_v56 = vld [vmem:[#allocation6 + $0x54] sm:$0xf] }
 0x227   :  { %v455_v58 = vpop.f32.mrf.mxu2 }
 0x228   :  { %v456_v59 = vadd.f32 %v455_v58, %v2877_v39  ;;  %v2538_v58 = vld [vmem:[#allocation6 + $0x12c] sm:$0xf0] }
 0x22a   :  { %v473_v61 = vmax.f32 %v456_v59, 0.0  ;;  %v2367_v59 = vor.u32 %v2538_v58, %v2366_v57  ;;  %v2272_v57 = vld [vmem:[#allocation6 + $0x70] sm:$0xf0] }
 0x22b   :  { %v2275_v58 = vor.u32 %v2510_v56, %v2272_v57 }
 0x22c   :  { %v481_v62 = vpack.c.bf16 %v473_v61, %v472_v60  ;;  %v2534_v60 = vld [vmem:[#allocation6 + $0x114] sm:$0xf]  ;;  %1224 = vmatpush.bf16.msra.mxu0 %v2367_v59 }
 0x22d   :  { %v2368_v61 = vld [vmem:[#allocation6 + $0x130] sm:$0xf0] }
 0x22e   :  { %590 = vmatmul.bf16.gmra.mxu3 %v481_v62  ;;  %v2371_v62 = vor.u32 %v2534_v60, %v2368_v61 }
 0x230   :  { %1273 = vmatpush.bf16.msra.mxu1 %v2371_v62  ;;  %1225 = vmatpush.bf16.msra.mxu0 %v2335_v13  ;;  %v2243_v13 = vor.u32 %v2502_v11, %v2240_v12 }
 0x234   :  { %1274 = vmatpush.bf16.msra.mxu1 %v2339_v16  ;;  %1226 = vmatpush.bf16.msra.mxu0 %v2303_v34 }
 0x238   :  { %1275 = vmatpush.bf16.msra.mxu1 %v2307_v40  ;;  %1227 = vmatpush.bf16.msra.mxu0 %v2271_v55 }
 0x23c   :  { %1276 = vmatpush.bf16.msra.mxu1 %v2275_v58 }
 0x240   :  { %1277 = vmatpush.bf16.msra.mxu1 %v2243_v13 }
 0x241   :  { %v556_v39 = vpop.f32.mrf.mxu3 }
 0x242   :  { %v557_v24 = vadd.f32 %v556_v39, %v2895_v19  ;;  %v2347_v39 = vor.u32 %v2527_v8, %v2344_v10  ;;  %v2238_v8 = vld [vmem:[#allocation6 + $0x10] sm:$0xf] }
 0x244   :  { %v596_v27 = vmax.f32 %v557_v24, 0.0  ;;  %1372 = vmatpush.bf16.msra.mxu3 %v2347_v39  ;;  %v2239_v39 = vor.u32 %v2506_v9, %v2238_v8 }
 0x246   :  { %1228 = vmatpush.bf16.msra.mxu0 %v2239_v39 }
 0x249   :  { %v558_v25 = vpop.f32.mrf.mxu3 }
 0x24a   :  { %v559_v26 = vadd.f32 %v558_v25, %v2895_v19  ;;  %v2310_v25 = vld [vmem:[#allocation6 + $0x98] sm:$0xf] }
 0x24c   :  { %v597_v28 = vmax.f32 %v559_v26, 0.0  ;;  %v2523_v26 = vld [vmem:[#allocation6 + $0xb4] sm:$0xf0] }
 0x24e   :  { %v2899_v29 = vpack.c.bf16 %v597_v28, %v596_v27  ;;  %v2519_v27 = vld [vmem:[#allocation6 + $0x9c] sm:$0xf]  ;;  %v2311_v28 = vor.u32 %v2523_v26, %v2310_v25 }
 0x250   :  { %1033 = vmatmul.bf16.vlgmr.msrb.gmra.mxu0 %v2899_v29  ;;  %1082 = vmatmul.bf16.vlgmr.msrb.gmra.mxu1 %v2899_v29 }
 0x251   :  { %1131 = vmatmul.bf16.vlgmr.msrb.gmra.mxu2 %v2899_v29  ;;  %1180 = vmatmul.bf16.vlgmr.msrb.gmra.mxu3 %v2899_v29  ;;  %v561_v30 = vpop.f32.mrf.mxu3 }
 0x252   :  { %v562_v35 = vadd.f32 %v561_v30, %v2895_v19  ;;  %v2312_v30 = vld [vmem:[#allocation6 + $0xb8] sm:$0xf0]  ;;  %1324 = vmatpush.bf16.msra.mxu2 %v2311_v28 }
 0x253   :  { %v2315_v31 = vor.u32 %v2519_v27, %v2312_v30  ;;  %v685_v30 = vld [vmem:[#allocation8 + $0x4] ss:$8 sm:$0xf] }
 0x254   :  { %v598_v37 = vmax.f32 %v562_v35, 0.0 }
 0x255   :  { %1373 = vmatpush.bf16.msra.mxu3 %v2315_v31  ;;  %v686_v31 = vld [vmem:[#allocation8 + $0x4] ss:$8 sm:$0xf0] }
 0x256   :  { %v2961_v32 = vor.u32 %v686_v31, %v685_v30 }
 0x258   :  { %v2964_v33 = vperm.slane %v2961_v32, 0 }
 0x259   :  { %v563_v46 = vpop.f32.mrf.mxu3 }
 0x25a   :  { %v564_v47 = vadd.f32 %v563_v46, %v2895_v19 }
 0x25c   :  { %v599_v48 = vmax.f32 %v564_v47, 0.0  ;;  %v2278_v47 = vld [vmem:[#allocation6 + $0x58] sm:$0xf] }
 0x25e   :  { %v2907_v49 = vpack.c.bf16 %v599_v48, %v598_v37  ;;  %v2515_v37 = vld [vmem:[#allocation6 + $0x74] sm:$0xf0]  ;;  %v2511_v48 = vld [vmem:[#allocation6 + $0x5c] sm:$0xf] }
 0x25f   :  { %v2283_v52 = vor.u32 %v2511_v48, %v2280_v51 }
 0x260   :  { %1038 = vmatmul.bf16.gmra.mxu0 %v2907_v49  ;;  %1087 = vmatmul.bf16.gmra.mxu1 %v2907_v49 }
 0x261   :  { %1136 = vmatmul.bf16.gmra.mxu2 %v2907_v49  ;;  %1185 = vmatmul.bf16.gmra.mxu3 %v2907_v49  ;;  %v566_v50 = vpop.f32.mrf.mxu3 }
 0x262   :  { %v567_v63 = vadd.f32 %v566_v50, %v2895_v19  ;;  %v2279_v50 = vor.u32 %v2515_v37, %v2278_v47  ;;  %1374 = vmatpush.bf16.msra.mxu3 %v2283_v52 }
 0x264   :  { %v600_v2 = vmax.f32 %v567_v63, 0.0  ;;  %1325 = vmatpush.bf16.msra.mxu2 %v2279_v50 }
 0x269   :  { %v568_v0 = vpop.f32.mrf.mxu3 }
 0x26a   :  { %v569_v1 = vadd.f32 %v568_v0, %v2895_v19 }
 0x26c   :  { %v601_v3 = vmax.f32 %v569_v1, 0.0 }
 0x26e   :  { %v2915_v4 = vpack.c.bf16 %v601_v3, %v600_v2  ;;  %v2246_v2 = vld [vmem:[#allocation6 + $0x18] sm:$0xf] }
 0x26f   :  { %v2507_v3 = vld [vmem:[#allocation6 + $0x34] sm:$0xf0] }
 0x270   :  { %1043 = vmatmul.bf16.gmra.mxu0 %v2915_v4  ;;  %1092 = vmatmul.bf16.gmra.mxu1 %v2915_v4  ;;  %v2247_v6 = vor.u32 %v2507_v3, %v2246_v2 }
 0x271   :  { %1141 = vmatmul.bf16.gmra.mxu2 %v2915_v4  ;;  %1190 = vmatmul.bf16.gmra.mxu3 %v2915_v4  ;;  %v571_v5 = vpop.f32.mrf.mxu3 }
 0x272   :  { %v572_v17 = vadd.f32 %v571_v5, %v2895_v19  ;;  %v2503_v5 = vld [vmem:[#allocation6 + $0x1c] sm:$0xf]  ;;  %1326 = vmatpush.bf16.msra.mxu2 %v2247_v6 }
 0x273   :  { %v2251_v10 = vor.u32 %v2503_v5, %v2248_v7 }
 0x274   :  { %v602_v21 = vmax.f32 %v572_v17, 0.0 }
 0x275   :  { %1375 = vmatpush.bf16.msra.mxu3 %v2251_v10 }
 0x279   :  { %v573_v18 = vpop.f32.mrf.mxu3 }
 0x27a   :  { %v574_v20 = vadd.f32 %v573_v18, %v2895_v19 }
 0x27c   :  { %v603_v22 = vmax.f32 %v574_v20, 0.0 }
 0x27e   :  { %v2923_v23 = vpack.c.bf16 %v603_v22, %v602_v21 }
 0x280   :  { %1048 = vmatmul.bf16.gmra.mxu0 %v2923_v23  ;;  %1097 = vmatmul.bf16.gmra.mxu1 %v2923_v23 }
 0x281   :  { %1146 = vmatmul.bf16.gmra.mxu2 %v2923_v23  ;;  %1195 = vmatmul.bf16.gmra.mxu3 %v2923_v23  ;;  %v576_v24 = vpop.f32.mrf.mxu3 }
 0x282   :  { %v577_v41 = vadd.f32 %v576_v24, %v2895_v19 }
 0x284   :  { %v604_v44 = vmax.f32 %v577_v41, 0.0 }
 0x289   :  { %v578_v42 = vpop.f32.mrf.mxu3 }
 0x28a   :  { %v579_v43 = vadd.f32 %v578_v42, %v2895_v19 }
 0x28c   :  { %v605_v45 = vmax.f32 %v579_v43, 0.0  ;;  %v2976_v43 = vperm.slane %v2961_v32, 2 }
 0x28e   :  { %v2931_v35 = vpack.c.bf16 %v605_v45, %v604_v44  ;;  %v2979_v44 = vperm.slane %v2961_v32, 3 }
 0x290   :  { %1053 = vmatmul.bf16.gmra.mxu0 %v2931_v35  ;;  %1102 = vmatmul.bf16.gmra.mxu1 %v2931_v35 }
 0x291   :  { %1151 = vmatmul.bf16.gmra.mxu2 %v2931_v35  ;;  %1200 = vmatmul.bf16.gmra.mxu3 %v2931_v35  ;;  %v581_v46 = vpop.f32.mrf.mxu3 }
 0x292   :  { %v582_v59 = vadd.f32 %v581_v46, %v2895_v19 }
 0x294   :  { %v606_v62 = vmax.f32 %v582_v59, 0.0 }
 0x299   :  { %v583_v60 = vpop.f32.mrf.mxu3 }
 0x29a   :  { %v584_v61 = vadd.f32 %v583_v60, %v2895_v19 }
 0x29c   :  { %v607_v63 = vmax.f32 %v584_v61, 0.0 }
 0x29e   :  { %v2939_v0 = vpack.c.bf16 %v607_v63, %v606_v62 }
 0x2a0   :  { %1058 = vmatmul.bf16.gmra.mxu0 %v2939_v0  ;;  %1107 = vmatmul.bf16.gmra.mxu1 %v2939_v0 }
 0x2a1   :  { %1156 = vmatmul.bf16.gmra.mxu2 %v2939_v0  ;;  %1205 = vmatmul.bf16.gmra.mxu3 %v2939_v0  ;;  %v586_v1 = vpop.f32.mrf.mxu3 }
 0x2a2   :  { %v587_v14 = vadd.f32 %v586_v1, %v2895_v19 }
 0x2a4   :  { %v608_v17 = vmax.f32 %v587_v14, 0.0 }
 0x2a9   :  { %v588_v15 = vpop.f32.mrf.mxu3 }
 0x2aa   :  { %v589_v16 = vadd.f32 %v588_v15, %v2895_v19 }
 0x2ac   :  { %v609_v18 = vmax.f32 %v589_v16, 0.0 }
 0x2ae   :  { %v2947_v20 = vpack.c.bf16 %v609_v18, %v608_v17 }
 0x2b0   :  { %1063 = vmatmul.bf16.gmra.mxu0 %v2947_v20  ;;  %1112 = vmatmul.bf16.gmra.mxu1 %v2947_v20 }
 0x2b1   :  { %1161 = vmatmul.bf16.gmra.mxu2 %v2947_v20  ;;  %1210 = vmatmul.bf16.gmra.mxu3 %v2947_v20  ;;  %v591_v21 = vpop.f32.mrf.mxu3 }
 0x2b2   :  { %v592_v22 = vadd.f32 %v591_v21, %v2895_v19 }
 0x2b4   :  { %v610_v26 = vmax.f32 %v592_v22, 0.0 }
 0x2b9   :  { %v593_v24 = vpop.f32.mrf.mxu3 }
 0x2ba   :  { %v594_v25 = vadd.f32 %v593_v24, %v2895_v19  ;;  %v2967_v19 = vperm.slane %v2961_v32, 1 }
 0x2bc   :  { %v611_v27 = vmax.f32 %v594_v25, 0.0 }
 0x2be   :  { %v2955_v28 = vpack.c.bf16 %v611_v27, %v610_v26 }
 0x2c0   :  { %1068 = vmatmul.bf16.gmra.mxu0 %v2955_v28  ;;  %1117 = vmatmul.bf16.gmra.mxu1 %v2955_v28 }
 0x2c1   :  { %1166 = vmatmul.bf16.gmra.mxu2 %v2955_v28  ;;  %1215 = vmatmul.bf16.gmra.mxu3 %v2955_v28 }
 0x2cd   :  { %v1034_v34 = vpop.f32.mrf.mxu0  ;;  %v1083_v36 = vpop.f32.mrf.mxu1 }
 0x2ce   :  { %v1035_v38 = vadd.f32 %v1034_v34, %v2964_v33  ;;  %v1084_v40 = vadd.f32 %v1083_v36, %v2967_v19 }
 0x2d0   :  { %v1417_v41 = vmax.f32 %v1035_v38, 0.0  ;;  %v1418_v42 = vmax.f32 %v1084_v40, 0.0  ;;  %1229 = vmatmul.bf16.vlgmr.msra.gmra.mxu0 %v2899_v29  ;;  %1278 = vmatmul.bf16.vlgmr.msra.gmra.mxu1 %v2899_v29 }
 0x2d1   :  { %1327 = vmatmul.bf16.vlgmr.msra.gmra.mxu2 %v2899_v29  ;;  %1376 = vmatmul.bf16.vlgmr.msra.gmra.mxu3 %v2899_v29 }
 0x2d2   :  { %v1545_v45 = vpack.c.bf16 %v1418_v42, %v1417_v41 }
 0x2d4   :  { %v1132_v46 = vpop.f32.mrf.mxu2  ;;  %v1181_v47 = vpop.f32.mrf.mxu3  ;;  %v1609_v59 = vunpack.c.l.bf16 %v1545_v45  ;;  %v1610_v60 = vunpack.c.h.bf16 %v1545_v45 }
 0x2d5   :  { %v1133_v37 = vadd.f32 %v1132_v46, %v2976_v43  ;;  %v1182_v48 = vadd.f32 %v1181_v47, %v2979_v44  ;;  %v1036_v50 = vpop.f32.mrf.mxu0  ;;  %v1085_v51 = vpop.f32.mrf.mxu1 }
 0x2d6   :  { %v1037_v52 = vadd.f32 %v1036_v50, %v2964_v33  ;;  %v1086_v53 = vadd.f32 %v1085_v51, %v2967_v19 }
 0x2d7   :  { %v1419_v29 = vmax.f32 %v1133_v37, 0.0  ;;  %v1420_v54 = vmax.f32 %v1182_v48, 0.0 }
 0x2d8   :  { %v1425_v55 = vmax.f32 %v1037_v52, 0.0  ;;  %v1426_v56 = vmax.f32 %v1086_v53, 0.0 }
 0x2d9   :  { %v1546_v57 = vpack.c.bf16 %v1420_v54, %v1419_v29 }
 0x2da   :  { %v1549_v58 = vpack.c.bf16 %v1426_v56, %v1425_v55 }
 0x2db   :  { %v1611_v16 = vunpack.c.l.bf16 %v1546_v57  ;;  %v1612_v17 = vunpack.c.h.bf16 %v1546_v57 }
 0x2dc   :  { %v1617_v61 = vunpack.c.l.bf16 %v1549_v58  ;;  %v1618_v62 = vunpack.c.h.bf16 %v1549_v58  ;;  %v1134_v63 = vpop.f32.mrf.mxu2  ;;  %v1183_v1 = vpop.f32.mrf.mxu3 }
 0x2dd   :  { %v1135_v2 = vadd.f32 %v1134_v63, %v2976_v43  ;;  %v1184_v3 = vadd.f32 %v1183_v1, %v2979_v44  ;;  %v1039_v5 = vpop.f32.mrf.mxu0  ;;  %v1088_v6 = vpop.f32.mrf.mxu1 }
 0x2de   :  { %v1737_v7 = vmax.f32 %v1609_v59, %v1617_v61  ;;  %v1750_v8 = vmax.f32 %v1610_v60, %v1618_v62  ;;  %v1040_v9 = vadd.f32 %v1039_v5, %v2964_v33  ;;  %v1089_v10 = vadd.f32 %v1088_v6, %v2967_v19 }
 0x2df   :  { %v1427_v39 = vmax.f32 %v1135_v2, 0.0  ;;  %v1428_v11 = vmax.f32 %v1184_v3, 0.0 }
 0x2e0   :  { %v1433_v12 = vmax.f32 %v1040_v9, 0.0  ;;  %v1434_v13 = vmax.f32 %v1089_v10, 0.0  ;;  %1234 = vmatmul.bf16.gmra.mxu0 %v2907_v49  ;;  %1283 = vmatmul.bf16.gmra.mxu1 %v2907_v49 }
 0x2e1   :  { %v1550_v14 = vpack.c.bf16 %v1428_v11, %v1427_v39  ;;  %1332 = vmatmul.bf16.gmra.mxu2 %v2907_v49  ;;  %1381 = vmatmul.bf16.gmra.mxu3 %v2907_v49 }
 0x2e2   :  { %v1553_v15 = vpack.c.bf16 %v1434_v13, %v1433_v12 }
 0x2e3   :  { %v1619_v18 = vunpack.c.l.bf16 %v1550_v14  ;;  %v1620_v21 = vunpack.c.h.bf16 %v1550_v14 }
 0x2e4   :  { %v1625_v22 = vunpack.c.l.bf16 %v1553_v15  ;;  %v1626_v24 = vunpack.c.h.bf16 %v1553_v15  ;;  %v1137_v25 = vpop.f32.mrf.mxu2  ;;  %v1186_v26 = vpop.f32.mrf.mxu3 }
 0x2e5   :  { %v1763_v27 = vmax.f32 %v1611_v16, %v1619_v18  ;;  %v1776_v30 = vmax.f32 %v1612_v17, %v1620_v21  ;;  %v1138_v31 = vadd.f32 %v1137_v25, %v2976_v43  ;;  %v1187_v34 = vadd.f32 %v1186_v26, %v2979_v44  ;;  %v1041_v36 = vpop.f32.mrf.mxu0  ;;  %v1090_v38 = vpop.f32.mrf.mxu1 }
 0x2e6   :  { %v1738_v40 = vmax.f32 %v1737_v7, %v1625_v22  ;;  %v1751_v41 = vmax.f32 %v1750_v8, %v1626_v24  ;;  %v1042_v49 = vadd.f32 %v1041_v36, %v2964_v33  ;;  %v1091_v42 = vadd.f32 %v1090_v38, %v2967_v19 }
 0x2e7   :  { %v1435_v45 = vmax.f32 %v1138_v31, 0.0  ;;  %v1436_v46 = vmax.f32 %v1187_v34, 0.0 }
 0x2e8   :  { %v1441_v47 = vmax.f32 %v1042_v49, 0.0  ;;  %v1442_v37 = vmax.f32 %v1091_v42, 0.0 }
 0x2e9   :  { %v1554_v48 = vpack.c.bf16 %v1436_v46, %v1435_v45 }
 0x2ea   :  { %v1557_v50 = vpack.c.bf16 %v1442_v37, %v1441_v47 }
 0x2eb   :  { %v1627_v51 = vunpack.c.l.bf16 %v1554_v48  ;;  %v1628_v52 = vunpack.c.h.bf16 %v1554_v48 }
 0x2ec   :  { %v1633_v53 = vunpack.c.l.bf16 %v1557_v50  ;;  %v1634_v29 = vunpack.c.h.bf16 %v1557_v50  ;;  %v1139_v54 = vpop.f32.mrf.mxu2  ;;  %v1188_v55 = vpop.f32.mrf.mxu3 }
 0x2ed   :  { %v1764_v56 = vmax.f32 %v1763_v27, %v1627_v51  ;;  %v1777_v57 = vmax.f32 %v1776_v30, %v1628_v52  ;;  %v1140_v58 = vadd.f32 %v1139_v54, %v2976_v43  ;;  %v1189_v59 = vadd.f32 %v1188_v55, %v2979_v44  ;;  %v1044_v60 = vpop.f32.mrf.mxu0  ;;  %v1093_v61 = vpop.f32.mrf.mxu1 }
 0x2ee   :  { %v1739_v62 = vmax.f32 %v1738_v40, %v1633_v53  ;;  %v1752_v63 = vmax.f32 %v1751_v41, %v1634_v29  ;;  %v1045_v1 = vadd.f32 %v1044_v60, %v2964_v33  ;;  %v1094_v2 = vadd.f32 %v1093_v61, %v2967_v19 }
 0x2ef   :  { %v1443_v3 = vmax.f32 %v1140_v58, 0.0  ;;  %v1444_v5 = vmax.f32 %v1189_v59, 0.0 }
 0x2f0   :  { %v1449_v6 = vmax.f32 %v1045_v1, 0.0  ;;  %v1450_v7 = vmax.f32 %v1094_v2, 0.0  ;;  %1239 = vmatmul.bf16.gmra.mxu0 %v2915_v4  ;;  %1288 = vmatmul.bf16.gmra.mxu1 %v2915_v4 }
 0x2f1   :  { %v1558_v8 = vpack.c.bf16 %v1444_v5, %v1443_v3  ;;  %1337 = vmatmul.bf16.gmra.mxu2 %v2915_v4  ;;  %1386 = vmatmul.bf16.gmra.mxu3 %v2915_v4 }
 0x2f2   :  { %v1561_v9 = vpack.c.bf16 %v1450_v7, %v1449_v6 }
 0x2f3   :  { %v1635_v10 = vunpack.c.l.bf16 %v1558_v8  ;;  %v1636_v39 = vunpack.c.h.bf16 %v1558_v8 }
 0x2f4   :  { %v1641_v11 = vunpack.c.l.bf16 %v1561_v9  ;;  %v1642_v12 = vunpack.c.h.bf16 %v1561_v9  ;;  %v1142_v13 = vpop.f32.mrf.mxu2  ;;  %v1191_v14 = vpop.f32.mrf.mxu3 }
 0x2f5   :  { %v1765_v15 = vmax.f32 %v1764_v56, %v1635_v10  ;;  %v1778_v16 = vmax.f32 %v1777_v57, %v1636_v39  ;;  %v1143_v17 = vadd.f32 %v1142_v13, %v2976_v43  ;;  %v1192_v18 = vadd.f32 %v1191_v14, %v2979_v44  ;;  %v1046_v21 = vpop.f32.mrf.mxu0  ;;  %v1095_v22 = vpop.f32.mrf.mxu1 }
 0x2f6   :  { %v1740_v24 = vmax.f32 %v1739_v62, %v1641_v11  ;;  %v1753_v25 = vmax.f32 %v1752_v63, %v1642_v12  ;;  %v1047_v26 = vadd.f32 %v1046_v21, %v2964_v33  ;;  %v1096_v4 = vadd.f32 %v1095_v22, %v2967_v19 }
 0x2f7   :  { %v1451_v27 = vmax.f32 %v1143_v17, 0.0  ;;  %v1452_v30 = vmax.f32 %v1192_v18, 0.0 }
 0x2f8   :  { %v1457_v31 = vmax.f32 %v1047_v26, 0.0  ;;  %v1458_v34 = vmax.f32 %v1096_v4, 0.0 }
 0x2f9   :  { %v1562_v36 = vpack.c.bf16 %v1452_v30, %v1451_v27 }
 0x2fa   :  { %v1565_v38 = vpack.c.bf16 %v1458_v34, %v1457_v31 }
 0x2fb   :  { %v1643_v40 = vunpack.c.l.bf16 %v1562_v36  ;;  %v1644_v41 = vunpack.c.h.bf16 %v1562_v36 }
 0x2fc   :  { %v1649_v49 = vunpack.c.l.bf16 %v1565_v38  ;;  %v1650_v42 = vunpack.c.h.bf16 %v1565_v38  ;;  %v1144_v45 = vpop.f32.mrf.mxu2  ;;  %v1193_v46 = vpop.f32.mrf.mxu3 }
 0x2fd   :  { %v1766_v47 = vmax.f32 %v1765_v15, %v1643_v40  ;;  %v1779_v37 = vmax.f32 %v1778_v16, %v1644_v41  ;;  %v1145_v48 = vadd.f32 %v1144_v45, %v2976_v43  ;;  %v1194_v50 = vadd.f32 %v1193_v46, %v2979_v44  ;;  %v1049_v51 = vpop.f32.mrf.mxu0  ;;  %v1098_v52 = vpop.f32.mrf.mxu1 }
 0x2fe   :  { %v1741_v53 = vmax.f32 %v1740_v24, %v1649_v49  ;;  %v1754_v29 = vmax.f32 %v1753_v25, %v1650_v42  ;;  %v1050_v54 = vadd.f32 %v1049_v51, %v2964_v33  ;;  %v1099_v55 = vadd.f32 %v1098_v52, %v2967_v19 }
 0x2ff   :  { %v1459_v56 = vmax.f32 %v1145_v48, 0.0  ;;  %v1460_v57 = vmax.f32 %v1194_v50, 0.0 }
 0x300   :  { %v1465_v58 = vmax.f32 %v1050_v54, 0.0  ;;  %v1466_v59 = vmax.f32 %v1099_v55, 0.0  ;;  %1244 = vmatmul.bf16.gmra.mxu0 %v2923_v23  ;;  %1293 = vmatmul.bf16.gmra.mxu1 %v2923_v23 }
 0x301   :  { %v1566_v60 = vpack.c.bf16 %v1460_v57, %v1459_v56  ;;  %1342 = vmatmul.bf16.gmra.mxu2 %v2923_v23  ;;  %1391 = vmatmul.bf16.gmra.mxu3 %v2923_v23 }
 0x302   :  { %v1569_v61 = vpack.c.bf16 %v1466_v59, %v1465_v58 }
 0x303   :  { %v1651_v62 = vunpack.c.l.bf16 %v1566_v60  ;;  %v1652_v63 = vunpack.c.h.bf16 %v1566_v60 }
 0x304   :  { %v1657_v1 = vunpack.c.l.bf16 %v1569_v61  ;;  %v1658_v2 = vunpack.c.h.bf16 %v1569_v61  ;;  %v1147_v3 = vpop.f32.mrf.mxu2  ;;  %v1196_v5 = vpop.f32.mrf.mxu3 }
 0x305   :  { %v1767_v6 = vmax.f32 %v1766_v47, %v1651_v62  ;;  %v1780_v7 = vmax.f32 %v1779_v37, %v1652_v63  ;;  %v1148_v8 = vadd.f32 %v1147_v3, %v2976_v43  ;;  %v1197_v9 = vadd.f32 %v1196_v5, %v2979_v44  ;;  %v1051_v10 = vpop.f32.mrf.mxu0  ;;  %v1100_v39 = vpop.f32.mrf.mxu1 }
 0x306   :  { %v1742_v11 = vmax.f32 %v1741_v53, %v1657_v1  ;;  %v1755_v12 = vmax.f32 %v1754_v29, %v1658_v2  ;;  %v1052_v13 = vadd.f32 %v1051_v10, %v2964_v33  ;;  %v1101_v23 = vadd.f32 %v1100_v39, %v2967_v19 }
 0x307   :  { %v1467_v14 = vmax.f32 %v1148_v8, 0.0  ;;  %v1468_v15 = vmax.f32 %v1197_v9, 0.0 }
 0x308   :  { %v1473_v16 = vmax.f32 %v1052_v13, 0.0  ;;  %v1474_v17 = vmax.f32 %v1101_v23, 0.0 }
 0x309   :  { %v1570_v18 = vpack.c.bf16 %v1468_v15, %v1467_v14 }
 0x30a   :  { %v1573_v21 = vpack.c.bf16 %v1474_v17, %v1473_v16 }
 0x30b   :  { %v1659_v22 = vunpack.c.l.bf16 %v1570_v18  ;;  %v1660_v24 = vunpack.c.h.bf16 %v1570_v18 }
 0x30c   :  { %v1665_v25 = vunpack.c.l.bf16 %v1573_v21  ;;  %v1666_v26 = vunpack.c.h.bf16 %v1573_v21  ;;  %v1149_v4 = vpop.f32.mrf.mxu2  ;;  %v1198_v27 = vpop.f32.mrf.mxu3 }
 0x30d   :  { %v1768_v30 = vmax.f32 %v1767_v6, %v1659_v22  ;;  %v1781_v31 = vmax.f32 %v1780_v7, %v1660_v24  ;;  %v1150_v34 = vadd.f32 %v1149_v4, %v2976_v43  ;;  %v1199_v36 = vadd.f32 %v1198_v27, %v2979_v44  ;;  %v3023_v38 = vpop.f32.mrf.mxu0  ;;  %v3025_v40 = vpop.f32.mrf.mxu1 }
 0x30e   :  { %v1743_v41 = vmax.f32 %v1742_v11, %v1665_v25  ;;  %v1756_v49 = vmax.f32 %v1755_v12, %v1666_v26 }
 0x30f   :  { %v1475_v42 = vmax.f32 %v1150_v34, 0.0  ;;  %v1476_v45 = vmax.f32 %v1199_v36, 0.0 }
 0x310   :  { %v1744_v46 = vrot.slane %v1743_v41, 4  ;;  %v1757_v47 = vrot.slane %v1756_v49, 4  ;;  %1249 = vmatmul.bf16.gmra.mxu0 %v2931_v35  ;;  %1298 = vmatmul.bf16.gmra.mxu1 %v2931_v35 }
 0x311   :  { %v1574_v37 = vpack.c.bf16 %v1476_v45, %v1475_v42  ;;  %1347 = vmatmul.bf16.gmra.mxu2 %v2931_v35  ;;  %1396 = vmatmul.bf16.gmra.mxu3 %v2931_v35  ;;  %v1104_v42 = vadd.f32 %v3025_v40, %v2967_v19 }
 0x312   :  { %v1745_v48 = vmax.f32 %v1743_v41, %v1744_v46  ;;  %v1758_v50 = vmax.f32 %v1756_v49, %v1757_v47  ;;  %v1055_v41 = vadd.f32 %v3023_v38, %v2964_v33 }
 0x313   :  { %v1667_v51 = vunpack.c.l.bf16 %v1574_v37  ;;  %v1668_v52 = vunpack.c.h.bf16 %v1574_v37 }
 0x314   :  { %v1746_v53 = vrot.slane %v1745_v48, 2  ;;  %v1759_v29 = vrot.slane %v1758_v50, 2  ;;  %v1152_v54 = vpop.f32.mrf.mxu2  ;;  %v1201_v55 = vpop.f32.mrf.mxu3 }
 0x315   :  { %v1769_v56 = vmax.f32 %v1768_v30, %v1667_v51  ;;  %v1782_v57 = vmax.f32 %v1781_v31, %v1668_v52  ;;  %v1056_v58 = vpop.f32.mrf.mxu0  ;;  %v1105_v59 = vpop.f32.mrf.mxu1  ;;  %v1153_v37 = vadd.f32 %v1152_v54, %v2976_v43 }
 0x316   :  { %v1747_v60 = vmax.f32 %v1745_v48, %v1746_v53  ;;  %v1760_v61 = vmax.f32 %v1758_v50, %v1759_v29  ;;  %v1057_v45 = vadd.f32 %v1056_v58, %v2964_v33  ;;  %v1106_v46 = vadd.f32 %v1105_v59, %v2967_v19 }
 0x317   :  { %v1770_v62 = vrot.slane %v1769_v56, 4  ;;  %v1783_v63 = vrot.slane %v1782_v57, 4  ;;  %v1202_v48 = vadd.f32 %v1201_v55, %v2979_v44  ;;  %v1482_v58 = vmax.f32 %v1104_v42, 0.0 }
 0x318   :  { %v1748_v1 = vrot.slane %v1747_v60, 1  ;;  %v1761_v2 = vrot.slane %v1760_v61, 1  ;;  %v1489_v59 = vmax.f32 %v1057_v45, 0.0 }
 0x319   :  { %v1771_v3 = vmax.f32 %v1769_v56, %v1770_v62  ;;  %v1784_v35 = vmax.f32 %v1782_v57, %v1783_v63  ;;  %v1481_v57 = vmax.f32 %v1055_v41, 0.0  ;;  %v1484_v54 = vmax.f32 %v1202_v48, 0.0 }
 0x31a   :  { %v1749_v5 = vmax.f32 %v1747_v60, %v1748_v1  ;;  %v1762_v6 = vmax.f32 %v1760_v61, %v1761_v2  ;;  %v1490_v60 = vmax.f32 %v1106_v46, 0.0  ;;  %v1483_v61 = vmax.f32 %v1153_v37, 0.0 }
 0x31b   :  { %v1772_v7 = vrot.slane %v1771_v3, 2  ;;  %v1785_v8 = vrot.slane %v1784_v35, 2 }
 0x31c   :  { %v1945_v9 = vpack.c.bf16 %v1762_v6, %v1749_v5  ;;  %v1154_v10 = vpop.f32.mrf.mxu2  ;;  %v1203_v39 = vpop.f32.mrf.mxu3  ;;  %v1577_v6 = vpack.c.bf16 %v1482_v58, %v1481_v57 }
 0x31d   :  { %v1773_v11 = vmax.f32 %v1771_v3, %v1772_v7  ;;  %v1786_v12 = vmax.f32 %v1784_v35, %v1785_v8  ;;  %v1059_v13 = vpop.f32.mrf.mxu0  ;;  %v1108_v23 = vpop.f32.mrf.mxu1  ;;  %v1155_v38 = vadd.f32 %v1154_v10, %v2976_v43  ;;  %v1204_v50 = vadd.f32 %v1203_v39, %v2979_v44 }
 0x31e   :  { %v1957_v16 = vunpack.c.h.bf16 %v1945_v9  ;;  %v1956_v31 = vunpack.c.l.bf16 %v1945_v9  ;;  %v1060_v51 = vadd.f32 %v1059_v13, %v2964_v33  ;;  %v1109_v52 = vadd.f32 %v1108_v23, %v2967_v19 }
 0x31f   :  { %v1774_v14 = vrot.slane %v1773_v11, 1  ;;  %v1787_v15 = vrot.slane %v1786_v12, 1  ;;  %v1491_v62 = vmax.f32 %v1155_v38, 0.0  ;;  %v1492_v55 = vmax.f32 %v1204_v50, 0.0 }
 0x320   :  { %1254 = vmatmul.bf16.gmra.mxu0 %v2939_v0  ;;  %1303 = vmatmul.bf16.gmra.mxu1 %v2939_v0  ;;  %v1988_v25 = vrot.slane %v1957_v16, 6  ;;  %v1497_v63 = vmax.f32 %v1060_v51, 0.0  ;;  %v1498_v1 = vmax.f32 %v1109_v52, 0.0  ;;  %v1581_v7 = vpack.c.bf16 %v1490_v60, %v1489_v59 }
 0x321   :  { %v1775_v17 = vmax.f32 %v1773_v11, %v1774_v14  ;;  %v1788_v18 = vmax.f32 %v1786_v12, %v1787_v15  ;;  %1352 = vmatmul.bf16.gmra.mxu2 %v2939_v0  ;;  %1401 = vmatmul.bf16.gmra.mxu3 %v2939_v0  ;;  %v3060_v8 = vpack.c.bf16 %v1484_v54, %v1483_v61 }
 0x322   :  { %v2000_v49 = vsel %vm129_vm0, %v1956_v31, %v1988_v25  ;;  %v1582_v9 = vpack.c.bf16 %v1492_v55, %v1491_v62  ;;  %v1585_v10 = vpack.c.bf16 %v1498_v1, %v1497_v63 }
 0x323   :  { %v1946_v21 = vpack.c.bf16 %v1788_v18, %v1775_v17  ;;  %v1675_v25 = vunpack.c.l.bf16 %v3060_v8 }
 0x324   :  { %v1157_v22 = vpop.f32.mrf.mxu2  ;;  %v1206_v24 = vpop.f32.mrf.mxu3  ;;  %v1690_v41 = vunpack.c.h.bf16 %v1585_v10  ;;  %v1684_v52 = vunpack.c.h.bf16 %v1582_v9 }
 0x325   :  { %v1958_v26 = vunpack.c.l.bf16 %v1946_v21  ;;  %v1959_v4 = vunpack.c.h.bf16 %v1946_v21  ;;  %v1061_v27 = vpop.f32.mrf.mxu0  ;;  %v1110_v30 = vpop.f32.mrf.mxu1  ;;  %v1158_v2 = vadd.f32 %v1157_v22, %v2976_v43  ;;  %v1207_v3 = vadd.f32 %v1206_v24, %v2979_v44 }
 0x326   :  { %v1062_v35 = vadd.f32 %v1061_v27, %v2964_v33  ;;  %v1111_v5 = vadd.f32 %v1110_v30, %v2967_v19  ;;  %v1673_v21 = vunpack.c.l.bf16 %v1577_v6  ;;  %v1682_v22 = vunpack.c.h.bf16 %v1581_v7 }
 0x327   :  { %v1989_v34 = vrot.slane %v1958_v26, 4  ;;  %v1990_v36 = vrot.slane %v1959_v4, 2  ;;  %v1499_v23 = vmax.f32 %v1158_v2, 0.0  ;;  %v1500_v14 = vmax.f32 %v1207_v3, 0.0 }
 0x328   :  { %v1505_v15 = vmax.f32 %v1062_v35, 0.0  ;;  %v1506_v16 = vmax.f32 %v1111_v5, 0.0  ;;  %v1674_v24 = vunpack.c.h.bf16 %v1577_v6  ;;  %v1683_v27 = vunpack.c.l.bf16 %v1582_v9 }
 0x329   :  { %v2002_v0 = vsel %vm2001_vm2, %v1989_v34, %v1990_v36  ;;  %v1689_v30 = vunpack.c.l.bf16 %v1585_v10  ;;  %v1676_v36 = vunpack.c.h.bf16 %v3060_v8 }
 0x32a   :  { %v3044_v47 = vsel %vm2003_vm3, %v2000_v49, %v2002_v0  ;;  %v1586_v49 = vpack.c.bf16 %v1500_v14, %v1499_v23  ;;  %v1589_v0 = vpack.c.bf16 %v1506_v16, %v1505_v15  ;;  %v1854_v45 = vmax.f32 %v1674_v24, %v1682_v22 }
 0x32c   :  { %v1159_v40 = vpop.f32.mrf.mxu2  ;;  %v1208_v53 = vpop.f32.mrf.mxu3  ;;  %v1855_v58 = vmax.f32 %v1854_v45, %v1690_v41  ;;  %v1691_v59 = vunpack.c.l.bf16 %v1586_v49  ;;  %v1697_v60 = vunpack.c.l.bf16 %v1589_v0  ;;  %v1698_v61 = vunpack.c.h.bf16 %v1589_v0 }
 0x32d   :  { %v1064_v29 = vpop.f32.mrf.mxu0  ;;  %v1113_v56 = vpop.f32.mrf.mxu1  ;;  %v1160_v26 = vadd.f32 %v1159_v40, %v2976_v43  ;;  %v1209_v4 = vadd.f32 %v1208_v53, %v2979_v44  ;;  %v1867_v40 = vmax.f32 %v1675_v25, %v1683_v27  ;;  %v1692_v3 = vunpack.c.h.bf16 %v1586_v49 }
 0x32e   :  { %v1065_v39 = vadd.f32 %v1064_v29, %v2964_v33  ;;  %v1114_v11 = vadd.f32 %v1113_v56, %v2967_v19  ;;  %v1856_v23 = vmax.f32 %v1855_v58, %v1698_v61  ;;  %v3091_v61 = vperm.slane %v2961_v32, 6 }
 0x32f   :  { %v1507_v48 = vmax.f32 %v1160_v26, 0.0  ;;  %v1508_v38 = vmax.f32 %v1209_v4, 0.0  ;;  %v1868_v15 = vmax.f32 %v1867_v40, %v1691_v59 }
 0x330   :  { %1259 = vmatmul.bf16.gmra.mxu0 %v2947_v20  ;;  %1308 = vmatmul.bf16.gmra.mxu1 %v2947_v20  ;;  %v1513_v31 = vmax.f32 %v1065_v39, 0.0  ;;  %v1514_v34 = vmax.f32 %v1114_v11, 0.0  ;;  %v1880_v39 = vmax.f32 %v1676_v36, %v1684_v52 }
 0x331   :  { %1357 = vmatmul.bf16.gmra.mxu2 %v2947_v20  ;;  %1406 = vmatmul.bf16.gmra.mxu3 %v2947_v20  ;;  %v1681_v20 = vunpack.c.l.bf16 %v1581_v7  ;;  %v1590_v35 = vpack.c.bf16 %v1508_v38, %v1507_v48 }
 0x332   :  { %v1593_v29 = vpack.c.bf16 %v1514_v34, %v1513_v31  ;;  %v1881_v16 = vmax.f32 %v1880_v39, %v1692_v3 }
 0x333   :  { %v1841_v42 = vmax.f32 %v1673_v21, %v1681_v20  ;;  %v1700_v21 = vunpack.c.h.bf16 %v1590_v35 }
 0x334   :  { %v1162_v12 = vpop.f32.mrf.mxu2  ;;  %v1211_v13 = vpop.f32.mrf.mxu3  ;;  %v1705_v7 = vunpack.c.l.bf16 %v1593_v29  ;;  %v1706_v8 = vunpack.c.h.bf16 %v1593_v29  ;;  %v3085_v29 = vperm.slane %v2961_v32, 4 }
 0x335   :  { %v1066_v17 = vpop.f32.mrf.mxu0  ;;  %v1115_v18 = vpop.f32.mrf.mxu1  ;;  %v1163_v50 = vadd.f32 %v1162_v12, %v2976_v43  ;;  %v1212_v51 = vadd.f32 %v1211_v13, %v2979_v44  ;;  %v1842_v53 = vmax.f32 %v1841_v42, %v1689_v30  ;;  %v1882_v40 = vmax.f32 %v1881_v16, %v1700_v21 }
 0x336   :  { %v1067_v46 = vadd.f32 %v1066_v17, %v2964_v33  ;;  %v1116_v37 = vadd.f32 %v1115_v18, %v2967_v19  ;;  %v1699_v17 = vunpack.c.l.bf16 %v1590_v35  ;;  %v1857_v22 = vmax.f32 %v1856_v23, %v1706_v8 }
 0x337   :  { %v1515_v5 = vmax.f32 %v1163_v50, 0.0  ;;  %v1516_v6 = vmax.f32 %v1212_v51, 0.0  ;;  %v1843_v13 = vmax.f32 %v1842_v53, %v1697_v60 }
 0x338   :  { %v1521_v55 = vmax.f32 %v1067_v46, 0.0  ;;  %v1522_v63 = vmax.f32 %v1116_v37, 0.0  ;;  %v1869_v52 = vmax.f32 %v1868_v15, %v1699_v17 }
 0x339   :  { %v1594_v18 = vpack.c.bf16 %v1516_v6, %v1515_v5  ;;  %v1844_v20 = vmax.f32 %v1843_v13, %v1705_v7 }
 0x33a   :  { %v1597_v14 = vpack.c.bf16 %v1522_v63, %v1521_v55 }
 0x33b   :  { %v1707_v42 = vunpack.c.l.bf16 %v1594_v18  ;;  %v1708_v45 = vunpack.c.h.bf16 %v1594_v18 }
 0x33c   :  { %v1164_v56 = vpop.f32.mrf.mxu2  ;;  %v1213_v57 = vpop.f32.mrf.mxu3  ;;  %v1713_v36 = vunpack.c.l.bf16 %v1597_v14  ;;  %v1714_v41 = vunpack.c.h.bf16 %v1597_v14 }
 0x33d   :  { %v1069_v54 = vpop.f32.mrf.mxu0  ;;  %v1118_v62 = vpop.f32.mrf.mxu1  ;;  %v1165_v11 = vadd.f32 %v1164_v56, %v2976_v43  ;;  %v1214_v12 = vadd.f32 %v1213_v57, %v2979_v44  ;;  %v1883_v59 = vmax.f32 %v1882_v40, %v1708_v45 }
 0x33e   :  { %v1070_v1 = vadd.f32 %v1069_v54, %v2964_v33  ;;  %v1119_v2 = vadd.f32 %v1118_v62, %v2967_v19  ;;  %v1845_v56 = vmax.f32 %v1844_v20, %v1713_v36  ;;  %v1858_v57 = vmax.f32 %v1857_v22, %v1714_v41 }
 0x33f   :  { %v1523_v4 = vmax.f32 %v1165_v11, 0.0  ;;  %v1524_v27 = vmax.f32 %v1214_v12, 0.0 }
 0x340   :  { %v1529_v9 = vmax.f32 %v1070_v1, 0.0  ;;  %v1530_v10 = vmax.f32 %v1119_v2, 0.0  ;;  %1264 = vmatmul.bf16.gmra.mxu0 %v2955_v28  ;;  %1313 = vmatmul.bf16.gmra.mxu1 %v2955_v28 }
 0x341   :  { %1362 = vmatmul.bf16.gmra.mxu2 %v2955_v28  ;;  %1411 = vmatmul.bf16.gmra.mxu3 %v2955_v28  ;;  %v1598_v53 = vpack.c.bf16 %v1524_v27, %v1523_v4 }
 0x342   :  { %v1601_v24 = vpack.c.bf16 %v1530_v10, %v1529_v9 }
 0x343   :  { %v1715_v3 = vunpack.c.l.bf16 %v1598_v53  ;;  %v1716_v35 = vunpack.c.h.bf16 %v1598_v53 }
 0x344   :  { %v1167_v25 = vpop.f32.mrf.mxu2  ;;  %v1216_v26 = vpop.f32.mrf.mxu3  ;;  %v1721_v48 = vunpack.c.l.bf16 %v1601_v24  ;;  %v1722_v38 = vunpack.c.h.bf16 %v1601_v24 }
 0x345   :  { %v1168_v30 = vadd.f32 %v1167_v25, %v2976_v43  ;;  %v1217_v31 = vadd.f32 %v1216_v26, %v2979_v44  ;;  %v1071_v28 = vpop.f32.mrf.mxu0  ;;  %v1120_v34 = vpop.f32.mrf.mxu1 }
 0x346   :  { %v1072_v49 = vadd.f32 %v1071_v28, %v2964_v33  ;;  %v1121_v0 = vadd.f32 %v1120_v34, %v2967_v19  ;;  %v3088_v33 = vperm.slane %v2961_v32, 5  ;;  %v1870_v19 = vmax.f32 %v1869_v52, %v1707_v42 }
 0x347   :  { %v1531_v46 = vmax.f32 %v1168_v30, 0.0  ;;  %v1532_v37 = vmax.f32 %v1217_v31, 0.0  ;;  %v1846_v54 = vmax.f32 %v1845_v56, %v1721_v48  ;;  %v1859_v62 = vmax.f32 %v1858_v57, %v1722_v38 }
 0x348   :  { %v1537_v50 = vmax.f32 %v1072_v49, 0.0  ;;  %v1538_v51 = vmax.f32 %v1121_v0, 0.0  ;;  %v1871_v21 = vmax.f32 %v1870_v19, %v1715_v3 }
 0x349   :  { %v1602_v60 = vpack.c.bf16 %v1532_v37, %v1531_v46 }
 0x34a   :  { %v1605_v58 = vpack.c.bf16 %v1538_v51, %v1537_v50 }
 0x34b   :  { %v1723_v12 = vunpack.c.l.bf16 %v1602_v60  ;;  %v1724_v13 = vunpack.c.h.bf16 %v1602_v60 }
 0x34c   :  { %v1729_v55 = vunpack.c.l.bf16 %v1605_v58  ;;  %v1730_v63 = vunpack.c.h.bf16 %v1605_v58  ;;  %v1169_v1 = vpop.f32.mrf.mxu2  ;;  %v1218_v2 = vpop.f32.mrf.mxu3 }
 0x34d   :  { %v1170_v5 = vadd.f32 %v1169_v1, %v2976_v43  ;;  %v1219_v6 = vadd.f32 %v1218_v2, %v2979_v44  ;;  %v1230_v7 = vpop.f32.mrf.mxu0  ;;  %v1279_v8 = vpop.f32.mrf.mxu1  ;;  %v1884_v43 = vmax.f32 %v1883_v59, %v1716_v35  ;;  %v3098_v44 = vperm.slane %v2961_v32, 7 }
 0x34e   :  { %v1847_v9 = vmax.f32 %v1846_v54, %v1729_v55  ;;  %v1860_v10 = vmax.f32 %v1859_v62, %v1730_v63  ;;  %v1231_v39 = vadd.f32 %v1230_v7, %v3085_v29  ;;  %v1280_v11 = vadd.f32 %v1279_v8, %v3088_v33 }
 0x34f   :  { %v1539_v23 = vmax.f32 %v1170_v5, 0.0  ;;  %v1540_v14 = vmax.f32 %v1219_v6, 0.0  ;;  %v1872_v26 = vmax.f32 %v1871_v21, %v1723_v12  ;;  %v1885_v4 = vmax.f32 %v1884_v43, %v1724_v13 }
 0x350   :  { %v1848_v15 = vrot.slane %v1847_v9, 4  ;;  %v1861_v16 = vrot.slane %v1860_v10, 4  ;;  %v1421_v17 = vmax.f32 %v1231_v39, 0.0  ;;  %v1422_v18 = vmax.f32 %v1280_v11, 0.0 }
 0x351   :  { %v1606_v20 = vpack.c.bf16 %v1540_v14, %v1539_v23 }
 0x352   :  { %v1849_v22 = vmax.f32 %v1847_v9, %v1848_v15  ;;  %v1862_v24 = vmax.f32 %v1860_v10, %v1861_v16  ;;  %v1547_v25 = vpack.c.bf16 %v1422_v18, %v1421_v17 }
 0x353   :  { %v1731_v27 = vunpack.c.l.bf16 %v1606_v20  ;;  %v1732_v30 = vunpack.c.h.bf16 %v1606_v20 }
 0x354   :  { %v1850_v31 = vrot.slane %v1849_v22, 2  ;;  %v1863_v28 = vrot.slane %v1862_v24, 2  ;;  %v1328_v34 = vpop.f32.mrf.mxu2  ;;  %v1377_v36 = vpop.f32.mrf.mxu3  ;;  %v1613_v2 = vunpack.c.l.bf16 %v1547_v25  ;;  %v1614_v35 = vunpack.c.h.bf16 %v1547_v25 }
 0x355   :  { %v1873_v41 = vmax.f32 %v1872_v26, %v1731_v27  ;;  %v1886_v49 = vmax.f32 %v1885_v4, %v1732_v30  ;;  %v1329_v0 = vadd.f32 %v1328_v34, %v3091_v61  ;;  %v1378_v42 = vadd.f32 %v1377_v36, %v3098_v44  ;;  %v1232_v45 = vpop.f32.mrf.mxu0  ;;  %v1281_v32 = vpop.f32.mrf.mxu1 }
 0x356   :  { %v1851_v46 = vmax.f32 %v1849_v22, %v1850_v31  ;;  %v1864_v37 = vmax.f32 %v1862_v24, %v1863_v28  ;;  %v1233_v48 = vadd.f32 %v1232_v45, %v3085_v29  ;;  %v1282_v38 = vadd.f32 %v1281_v32, %v3088_v33 }
 0x357   :  { %v1874_v50 = vrot.slane %v1873_v41, 4  ;;  %v1887_v51 = vrot.slane %v1886_v49, 4  ;;  %v1423_v52 = vmax.f32 %v1329_v0, 0.0  ;;  %v1424_v40 = vmax.f32 %v1378_v42, 0.0 }
 0x358   :  { %v1852_v53 = vrot.slane %v1851_v46, 1  ;;  %v1865_v56 = vrot.slane %v1864_v37, 1  ;;  %v1429_v57 = vmax.f32 %v1233_v48, 0.0  ;;  %v1430_v58 = vmax.f32 %v1282_v38, 0.0 }
 0x359   :  { %v1875_v19 = vmax.f32 %v1873_v41, %v1874_v50  ;;  %v1888_v59 = vmax.f32 %v1886_v49, %v1887_v51  ;;  %v1548_v60 = vpack.c.bf16 %v1424_v40, %v1423_v52 }
 0x35a   :  { %v1853_v54 = vmax.f32 %v1851_v46, %v1852_v53  ;;  %v1866_v62 = vmax.f32 %v1864_v37, %v1865_v56  ;;  %v1551_v55 = vpack.c.bf16 %v1430_v58, %v1429_v57 }
 0x35b   :  { %v1876_v63 = vrot.slane %v1875_v19, 2  ;;  %v1889_v1 = vrot.slane %v1888_v59, 2  ;;  %v1615_v26 = vunpack.c.l.bf16 %v1548_v60  ;;  %v1616_v31 = vunpack.c.h.bf16 %v1548_v60 }
 0x35c   :  { %v1949_v3 = vpack.c.bf16 %v1866_v62, %v1853_v54  ;;  %v1621_v5 = vunpack.c.l.bf16 %v1551_v55  ;;  %v1622_v6 = vunpack.c.h.bf16 %v1551_v55  ;;  %v1330_v7 = vpop.f32.mrf.mxu2  ;;  %v1379_v8 = vpop.f32.mrf.mxu3 }
 0x35d   :  { %v1877_v9 = vmax.f32 %v1875_v19, %v1876_v63  ;;  %v1890_v10 = vmax.f32 %v1888_v59, %v1889_v1  ;;  %v1331_v39 = vadd.f32 %v1330_v7, %v3091_v61  ;;  %v1380_v11 = vadd.f32 %v1379_v8, %v3098_v44  ;;  %v1235_v12 = vpop.f32.mrf.mxu0  ;;  %v1284_v13 = vpop.f32.mrf.mxu1 }
 0x35e   :  { %v1789_v23 = vmax.f32 %v1613_v2, %v1621_v5  ;;  %v1802_v14 = vmax.f32 %v1614_v35, %v1622_v6  ;;  %v1965_v21 = vunpack.c.h.bf16 %v1949_v3  ;;  %v1236_v43 = vadd.f32 %v1235_v12, %v3085_v29 }
 0x35f   :  { %v1878_v15 = vrot.slane %v1877_v9, 1  ;;  %v1891_v16 = vrot.slane %v1890_v10, 1  ;;  %v1431_v17 = vmax.f32 %v1331_v39, 0.0  ;;  %v1432_v18 = vmax.f32 %v1380_v11, 0.0 }
 0x360   :  { %v1285_v20 = vadd.f32 %v1284_v13, %v3088_v33  ;;  %v1437_v4 = vmax.f32 %v1236_v43, 0.0  ;;  %v1964_v36 = vunpack.c.l.bf16 %v1949_v3  ;;  %v1994_v41 = vrot.slane %v1965_v21, 6 }
 0x361   :  { %v1879_v22 = vmax.f32 %v1877_v9, %v1878_v15  ;;  %v1892_v24 = vmax.f32 %v1890_v10, %v1891_v16  ;;  %v1552_v25 = vpack.c.bf16 %v1432_v18, %v1431_v17  ;;  %v2682_v5 = vmov 0  }
 0x362   :  { %v1438_v27 = vmax.f32 %v1285_v20, 0.0  ;;  %v2008_v63 = vsel %vm129_vm0, %v1964_v36, %v1994_v41  ;;  %v1954_v6 = vunpack.c.l.bf16 %v2682_v5 }
 0x363   :  { %v1950_v30 = vpack.c.bf16 %v1892_v24, %v1879_v22  ;;  %v1623_v28 = vunpack.c.l.bf16 %v1552_v25  ;;  %v1624_v34 = vunpack.c.h.bf16 %v1552_v25 }
 0x364   :  { %v1555_v49 = vpack.c.bf16 %v1438_v27, %v1437_v4  ;;  %v1333_v0 = vpop.f32.mrf.mxu2  ;;  %v1382_v42 = vpop.f32.mrf.mxu3 }
 0x365   :  { %v1966_v45 = vunpack.c.l.bf16 %v1950_v30  ;;  %v1967_v32 = vunpack.c.h.bf16 %v1950_v30  ;;  %v1815_v46 = vmax.f32 %v1615_v26, %v1623_v28  ;;  %v1828_v37 = vmax.f32 %v1616_v31, %v1624_v34  ;;  %v1237_v48 = vpop.f32.mrf.mxu0  ;;  %v1286_v38 = vpop.f32.mrf.mxu1 }
 0x366   :  { %v1629_v50 = vunpack.c.l.bf16 %v1555_v49  ;;  %v1630_v51 = vunpack.c.h.bf16 %v1555_v49  ;;  %v1334_v52 = vadd.f32 %v1333_v0, %v3091_v61  ;;  %v1383_v40 = vadd.f32 %v1382_v42, %v3098_v44 }
 0x367   :  { %v1995_v53 = vrot.slane %v1966_v45, 4  ;;  %v1996_v56 = vrot.slane %v1967_v32, 2  ;;  %v1238_v57 = vadd.f32 %v1237_v48, %v3085_v29  ;;  %v1287_v58 = vadd.f32 %v1286_v38, %v3088_v33 }
 0x368   :  { %v1790_v19 = vmax.f32 %v1789_v23, %v1629_v50  ;;  %v1803_v59 = vmax.f32 %v1802_v14, %v1630_v51  ;;  %v1439_v60 = vmax.f32 %v1334_v52, 0.0  ;;  %v1440_v54 = vmax.f32 %v1383_v40, 0.0 }
 0x369   :  { %v1445_v62 = vmax.f32 %v1238_v57, 0.0  ;;  %v1446_v55 = vmax.f32 %v1287_v58, 0.0  ;;  %v2009_v1 = vsel %vm2001_vm2, %v1995_v53, %v1996_v56 }
 0x36a   :  { %v1556_v2 = vpack.c.bf16 %v1440_v54, %v1439_v60  ;;  %v2010_v3 = vsel %vm2003_vm3, %v2008_v63, %v2009_v1 }
 0x36b   :  { %v1559_v35 = vpack.c.bf16 %v1446_v55, %v1445_v62  ;;  %v2019_v39 = vrot.slane %v2010_v3, 7 }
 0x36c   :  { %v1631_v7 = vunpack.c.l.bf16 %v1556_v2  ;;  %v1632_v8 = vunpack.c.h.bf16 %v1556_v2  ;;  %v1335_v9 = vpop.f32.mrf.mxu2  ;;  %v1384_v10 = vpop.f32.mrf.mxu3 }
 0x36d   :  { %v1637_v11 = vunpack.c.l.bf16 %v1559_v35  ;;  %v1638_v12 = vunpack.c.h.bf16 %v1559_v35  ;;  %v1336_v13 = vadd.f32 %v1335_v9, %v3091_v61  ;;  %v1385_v23 = vadd.f32 %v1384_v10, %v3098_v44  ;;  %v1240_v14 = vpop.f32.mrf.mxu0  ;;  %v1289_v15 = vpop.f32.mrf.mxu1 }
 0x36e   :  { %v1816_v16 = vmax.f32 %v1815_v46, %v1631_v7  ;;  %v1829_v17 = vmax.f32 %v1828_v37, %v1632_v8  ;;  %v1241_v18 = vadd.f32 %v1240_v14, %v3085_v29  ;;  %v1290_v21 = vadd.f32 %v1289_v15, %v3088_v33 }
 0x36f   :  { %v1791_v43 = vmax.f32 %v1790_v19, %v1637_v11  ;;  %v1804_v20 = vmax.f32 %v1803_v59, %v1638_v12  ;;  %v1447_v22 = vmax.f32 %v1336_v13, 0.0  ;;  %v1448_v24 = vmax.f32 %v1385_v23, 0.0 }
 0x370   :  { %v1453_v25 = vmax.f32 %v1241_v18, 0.0  ;;  %v1454_v26 = vmax.f32 %v1290_v21, 0.0  ;;  %v2021_v4 = vsel %vm2020_vm4, %v2019_v39, %v3044_v47 }
 0x371   :  { %v1560_v27 = vpack.c.bf16 %v1448_v24, %v1447_v22  ;;  %v2023_v30 = vsel %vm2022_vm5, %v2019_v39, %v2021_v4 }
 0x372   :  { %v1563_v31 = vpack.c.bf16 %v1454_v26, %v1453_v25  ;;  %v2025_v28 = vsel %vm2024_vm6, %v2019_v39, %v2023_v30 }
 0x373   :  { %v1639_v34 = vunpack.c.l.bf16 %v1560_v27  ;;  %v1640_v36 = vunpack.c.h.bf16 %v1560_v27  ;;  %v2027_v41 = vsel %vm2026_vm7, %v2019_v39, %v2025_v28 }
 0x374   :  { %v1645_v49 = vunpack.c.l.bf16 %v1563_v31  ;;  %v1646_v0 = vunpack.c.h.bf16 %v1563_v31  ;;  %v1338_v42 = vpop.f32.mrf.mxu2  ;;  %v1387_v45 = vpop.f32.mrf.mxu3  ;;  %v2037_v32 = vmax.f32 %v1954_v6, %v2027_v41 }
 0x375   :  { %v1817_v46 = vmax.f32 %v1816_v16, %v1639_v34  ;;  %v1830_v37 = vmax.f32 %v1829_v17, %v1640_v36  ;;  %v1339_v47 = vadd.f32 %v1338_v42, %v3091_v61  ;;  %v1388_v48 = vadd.f32 %v1387_v45, %v3098_v44  ;;  %v1242_v38 = vpop.f32.mrf.mxu0  ;;  %v1291_v50 = vpop.f32.mrf.mxu1 }
 0x376   :  { %v1792_v51 = vmax.f32 %v1791_v43, %v1645_v49  ;;  %v1805_v52 = vmax.f32 %v1804_v20, %v1646_v0  ;;  %v1243_v40 = vadd.f32 %v1242_v38, %v3085_v29  ;;  %v1292_v53 = vadd.f32 %v1291_v50, %v3088_v33  ;;  %2041 = vst [vmem:[#allocation1] ss:$4 sm:$0xff] %v2037_v32 }
 0x377   :  { %v1455_v56 = vmax.f32 %v1339_v47, 0.0  ;;  %v1456_v57 = vmax.f32 %v1388_v48, 0.0 }
 0x378   :  { %v1461_v58 = vmax.f32 %v1243_v40, 0.0  ;;  %v1462_v19 = vmax.f32 %v1292_v53, 0.0 }
 0x379   :  { %v1564_v59 = vpack.c.bf16 %v1456_v57, %v1455_v56 }
 0x37a   :  { %v1567_v60 = vpack.c.bf16 %v1462_v19, %v1461_v58 }
 0x37b   :  { %v1647_v54 = vunpack.c.l.bf16 %v1564_v59  ;;  %v1648_v62 = vunpack.c.h.bf16 %v1564_v59 }
 0x37c   :  { %v1653_v55 = vunpack.c.l.bf16 %v1567_v60  ;;  %v1654_v63 = vunpack.c.h.bf16 %v1567_v60  ;;  %v1340_v1 = vpop.f32.mrf.mxu2  ;;  %v1389_v2 = vpop.f32.mrf.mxu3 }
 0x37d   :  { %v1818_v3 = vmax.f32 %v1817_v46, %v1647_v54  ;;  %v1831_v35 = vmax.f32 %v1830_v37, %v1648_v62  ;;  %v1341_v6 = vadd.f32 %v1340_v1, %v3091_v61  ;;  %v1390_v7 = vadd.f32 %v1389_v2, %v3098_v44  ;;  %v1245_v8 = vpop.f32.mrf.mxu0  ;;  %v1294_v9 = vpop.f32.mrf.mxu1 }
 0x37e   :  { %v1793_v10 = vmax.f32 %v1792_v51, %v1653_v55  ;;  %v1806_v39 = vmax.f32 %v1805_v52, %v1654_v63  ;;  %v1246_v11 = vadd.f32 %v1245_v8, %v3085_v29  ;;  %v1295_v12 = vadd.f32 %v1294_v9, %v3088_v33 }
 0x37f   :  { %v1463_v13 = vmax.f32 %v1341_v6, 0.0  ;;  %v1464_v23 = vmax.f32 %v1390_v7, 0.0 }
 0x380   :  { %v1469_v14 = vmax.f32 %v1246_v11, 0.0  ;;  %v1470_v15 = vmax.f32 %v1295_v12, 0.0 }
 0x381   :  { %v1568_v16 = vpack.c.bf16 %v1464_v23, %v1463_v13 }
 0x382   :  { %v1571_v17 = vpack.c.bf16 %v1470_v15, %v1469_v14 }
 0x383   :  { %v1655_v18 = vunpack.c.l.bf16 %v1568_v16  ;;  %v1656_v21 = vunpack.c.h.bf16 %v1568_v16 }
 0x384   :  { %v1661_v43 = vunpack.c.l.bf16 %v1571_v17  ;;  %v1662_v20 = vunpack.c.h.bf16 %v1571_v17  ;;  %v1343_v22 = vpop.f32.mrf.mxu2  ;;  %v1392_v24 = vpop.f32.mrf.mxu3 }
 0x385   :  { %v1819_v25 = vmax.f32 %v1818_v3, %v1655_v18  ;;  %v1832_v26 = vmax.f32 %v1831_v35, %v1656_v21  ;;  %v1344_v4 = vadd.f32 %v1343_v22, %v3091_v61  ;;  %v1393_v27 = vadd.f32 %v1392_v24, %v3098_v44  ;;  %v1247_v30 = vpop.f32.mrf.mxu0  ;;  %v1296_v31 = vpop.f32.mrf.mxu1 }
 0x386   :  { %v1794_v28 = vmax.f32 %v1793_v10, %v1661_v43  ;;  %v1807_v34 = vmax.f32 %v1806_v39, %v1662_v20  ;;  %v1248_v36 = vadd.f32 %v1247_v30, %v3085_v29  ;;  %v1297_v41 = vadd.f32 %v1296_v31, %v3088_v33 }
 0x387   :  { %v1471_v49 = vmax.f32 %v1344_v4, 0.0  ;;  %v1472_v0 = vmax.f32 %v1393_v27, 0.0 }
 0x388   :  { %v1477_v42 = vmax.f32 %v1248_v36, 0.0  ;;  %v1478_v45 = vmax.f32 %v1297_v41, 0.0 }
 0x389   :  { %v1572_v32 = vpack.c.bf16 %v1472_v0, %v1471_v49 }
 0x38a   :  { %v1575_v46 = vpack.c.bf16 %v1478_v45, %v1477_v42 }
 0x38b   :  { %v1663_v37 = vunpack.c.l.bf16 %v1572_v32  ;;  %v1664_v47 = vunpack.c.h.bf16 %v1572_v32 }
 0x38c   :  { %v1669_v48 = vunpack.c.l.bf16 %v1575_v46  ;;  %v1670_v38 = vunpack.c.h.bf16 %v1575_v46  ;;  %v1345_v50 = vpop.f32.mrf.mxu2  ;;  %v1394_v51 = vpop.f32.mrf.mxu3 }
 0x38d   :  { %v1820_v52 = vmax.f32 %v1819_v25, %v1663_v37  ;;  %v1833_v40 = vmax.f32 %v1832_v26, %v1664_v47  ;;  %v1346_v53 = vadd.f32 %v1345_v50, %v3091_v61  ;;  %v1395_v56 = vadd.f32 %v1394_v51, %v3098_v44  ;;  %v1250_v57 = vpop.f32.mrf.mxu0  ;;  %v1299_v58 = vpop.f32.mrf.mxu1 }
 0x38e   :  { %v1795_v19 = vmax.f32 %v1794_v28, %v1669_v48  ;;  %v1808_v59 = vmax.f32 %v1807_v34, %v1670_v38 }
 0x38f   :  { %v1479_v60 = vmax.f32 %v1346_v53, 0.0  ;;  %v1480_v54 = vmax.f32 %v1395_v56, 0.0 }
 0x390   :  { %v1796_v62 = vrot.slane %v1795_v19, 4  ;;  %v1809_v55 = vrot.slane %v1808_v59, 4 }
 0x391   :  { %v1576_v63 = vpack.c.bf16 %v1480_v54, %v1479_v60 }
 0x392   :  { %v1797_v1 = vmax.f32 %v1795_v19, %v1796_v62  ;;  %v1810_v2 = vmax.f32 %v1808_v59, %v1809_v55  ;;  %v1300_v19 = vadd.f32 %v1299_v58, %v3088_v33 }
 0x393   :  { %v1671_v3 = vunpack.c.l.bf16 %v1576_v63  ;;  %v1672_v35 = vunpack.c.h.bf16 %v1576_v63 }
 0x394   :  { %v1798_v6 = vrot.slane %v1797_v1, 2  ;;  %v1811_v7 = vrot.slane %v1810_v2, 2  ;;  %v1348_v8 = vpop.f32.mrf.mxu2  ;;  %v1397_v9 = vpop.f32.mrf.mxu3 }
 0x395   :  { %v1821_v10 = vmax.f32 %v1820_v52, %v1671_v3  ;;  %v1834_v39 = vmax.f32 %v1833_v40, %v1672_v35  ;;  %v1252_v11 = vpop.f32.mrf.mxu0  ;;  %v1301_v12 = vpop.f32.mrf.mxu1  ;;  %v1251_v40 = vadd.f32 %v1250_v57, %v3085_v29  ;;  %v1349_v62 = vadd.f32 %v1348_v8, %v3091_v61 }
 0x396   :  { %v1799_v13 = vmax.f32 %v1797_v1, %v1798_v6  ;;  %v1812_v23 = vmax.f32 %v1810_v2, %v1811_v7  ;;  %v1253_v59 = vadd.f32 %v1252_v11, %v3085_v29  ;;  %v1302_v60 = vadd.f32 %v1301_v12, %v3088_v33 }
 0x397   :  { %v1822_v14 = vrot.slane %v1821_v10, 4  ;;  %v1835_v15 = vrot.slane %v1834_v39, 4  ;;  %v1398_v55 = vadd.f32 %v1397_v9, %v3098_v44  ;;  %v1485_v58 = vmax.f32 %v1251_v40, 0.0 }
 0x398   :  { %v1800_v16 = vrot.slane %v1799_v13, 1  ;;  %v1813_v17 = vrot.slane %v1812_v23, 1  ;;  %v1486_v6 = vmax.f32 %v1300_v19, 0.0  ;;  %v1493_v7 = vmax.f32 %v1253_v59, 0.0 }
 0x399   :  { %v1823_v18 = vmax.f32 %v1821_v10, %v1822_v14  ;;  %v1836_v21 = vmax.f32 %v1834_v39, %v1835_v15  ;;  %v1494_v10 = vmax.f32 %v1302_v60, 0.0  ;;  %v1487_v39 = vmax.f32 %v1349_v62, 0.0 }
 0x39a   :  { %v1801_v43 = vmax.f32 %v1799_v13, %v1800_v16  ;;  %v1814_v20 = vmax.f32 %v1812_v23, %v1813_v17  ;;  %v1488_v11 = vmax.f32 %v1398_v55, 0.0  ;;  %v1579_v23 = vpack.c.bf16 %v1486_v6, %v1485_v58 }
 0x39b   :  { %v1824_v22 = vrot.slane %v1823_v18, 2  ;;  %v1837_v24 = vrot.slane %v1836_v21, 2  ;;  %v1583_v14 = vpack.c.bf16 %v1494_v10, %v1493_v7 }
 0x39c   :  { %v1947_v25 = vpack.c.bf16 %v1814_v20, %v1801_v43  ;;  %v1350_v26 = vpop.f32.mrf.mxu2  ;;  %v1399_v4 = vpop.f32.mrf.mxu3  ;;  %v3156_v17 = vpack.c.bf16 %v1488_v11, %v1487_v39 }
 0x39d   :  { %v1825_v27 = vmax.f32 %v1823_v18, %v1824_v22  ;;  %v1838_v30 = vmax.f32 %v1836_v21, %v1837_v24  ;;  %v1255_v31 = vpop.f32.mrf.mxu0  ;;  %v1304_v28 = vpop.f32.mrf.mxu1  ;;  %v1351_v63 = vadd.f32 %v1350_v26, %v3091_v61  ;;  %v1400_v57 = vadd.f32 %v1399_v4, %v3098_v44 }
 0x39e   :  { %v1961_v41 = vunpack.c.h.bf16 %v1947_v25  ;;  %v1960_v50 = vunpack.c.l.bf16 %v1947_v25  ;;  %v1256_v8 = vadd.f32 %v1255_v31, %v3085_v29  ;;  %v1305_v9 = vadd.f32 %v1304_v28, %v3088_v33 }
 0x39f   :  { %v1826_v34 = vrot.slane %v1825_v27, 1  ;;  %v1839_v36 = vrot.slane %v1838_v30, 1  ;;  %v1495_v12 = vmax.f32 %v1351_v63, 0.0  ;;  %v1496_v13 = vmax.f32 %v1400_v57, 0.0 }
 0x3a0   :  { %v1991_v46 = vrot.slane %v1961_v41, 6  ;;  %v1501_v20 = vmax.f32 %v1256_v8, 0.0  ;;  %v1502_v22 = vmax.f32 %v1305_v9, 0.0 }
 0x3a1   :  { %v1827_v49 = vmax.f32 %v1825_v27, %v1826_v34  ;;  %v1840_v0 = vmax.f32 %v1838_v30, %v1839_v36  ;;  %v1584_v18 = vpack.c.bf16 %v1496_v13, %v1495_v12  ;;  %v1677_v27 = vunpack.c.l.bf16 %v1579_v23 }
 0x3a2   :  { %v2005_v53 = vsel %vm129_vm0, %v1960_v50, %v1991_v46  ;;  %v1685_v30 = vunpack.c.l.bf16 %v1583_v14 }
 0x3a3   :  { %v1948_v42 = vpack.c.bf16 %v1840_v0, %v1827_v49  ;;  %v1678_v0 = vunpack.c.h.bf16 %v1579_v23  ;;  %v1687_v46 = vunpack.c.l.bf16 %v1584_v18  ;;  %v1688_v60 = vunpack.c.h.bf16 %v1584_v18 }
 0x3a4   :  { %v1353_v45 = vpop.f32.mrf.mxu2  ;;  %v1402_v32 = vpop.f32.mrf.mxu3 }
 0x3a5   :  { %v1962_v37 = vunpack.c.l.bf16 %v1948_v42  ;;  %v1963_v47 = vunpack.c.h.bf16 %v1948_v42  ;;  %v1257_v48 = vpop.f32.mrf.mxu0  ;;  %v1306_v38 = vpop.f32.mrf.mxu1  ;;  %v1354_v24 = vadd.f32 %v1353_v45, %v3091_v61  ;;  %v1403_v25 = vadd.f32 %v1402_v32, %v3098_v44 }
 0x3a6   :  { %v1258_v15 = vadd.f32 %v1257_v48, %v3085_v29  ;;  %v1307_v16 = vadd.f32 %v1306_v38, %v3088_v33  ;;  %v1679_v42 = vunpack.c.l.bf16 %v3156_v17  ;;  %v1680_v45 = vunpack.c.h.bf16 %v3156_v17 }
 0x3a7   :  { %v1992_v51 = vrot.slane %v1962_v37, 4  ;;  %v1993_v52 = vrot.slane %v1963_v47, 2  ;;  %v1686_v32 = vunpack.c.h.bf16 %v1583_v14  ;;  %v1587_v37 = vpack.c.bf16 %v1502_v22, %v1501_v20 }
 0x3a8   :  { %v1509_v31 = vmax.f32 %v1258_v15, 0.0  ;;  %v1510_v28 = vmax.f32 %v1307_v16, 0.0  ;;  %v1503_v47 = vmax.f32 %v1354_v24, 0.0  ;;  %v1504_v48 = vmax.f32 %v1403_v25, 0.0 }
 0x3a9   :  { %v2006_v56 = vsel %vm2001_vm2, %v1992_v51, %v1993_v52  ;;  %v1893_v38 = vmax.f32 %v1677_v27, %v1685_v30  ;;  %v1906_v59 = vmax.f32 %v1678_v0, %v1686_v32  ;;  %v1932_v20 = vmax.f32 %v1680_v45, %v1688_v60 }
 0x3aa   :  { %v3146_v54 = vsel %vm2003_vm3, %v2005_v53, %v2006_v56  ;;  %v1591_v50 = vpack.c.bf16 %v1510_v28, %v1509_v31 }
 0x3ac   :  { %v1355_v1 = vpop.f32.mrf.mxu2  ;;  %v1404_v2 = vpop.f32.mrf.mxu3  ;;  %v1701_v12 = vunpack.c.l.bf16 %v1591_v50  ;;  %v1702_v13 = vunpack.c.h.bf16 %v1591_v50 }
 0x3ad   :  { %v1260_v3 = vpop.f32.mrf.mxu0  ;;  %v1309_v35 = vpop.f32.mrf.mxu1  ;;  %v1356_v34 = vadd.f32 %v1355_v1, %v3091_v61  ;;  %v1405_v36 = vadd.f32 %v1404_v2, %v3098_v44  ;;  %v1919_v1 = vmax.f32 %v1679_v42, %v1687_v46  ;;  %v1693_v2 = vunpack.c.l.bf16 %v1587_v37 }
 0x3ae   :  { %v1261_v41 = vadd.f32 %v1260_v3, %v3085_v29  ;;  %v1310_v49 = vadd.f32 %v1309_v35, %v3088_v33  ;;  %v1694_v3 = vunpack.c.h.bf16 %v1587_v37  ;;  %v1588_v35 = vpack.c.bf16 %v1504_v48, %v1503_v47 }
 0x3af   :  { %v1511_v40 = vmax.f32 %v1356_v34, 0.0  ;;  %v1512_v53 = vmax.f32 %v1405_v36, 0.0  ;;  %v1894_v17 = vmax.f32 %v1893_v38, %v1693_v2 }
 0x3b0   :  { %v1517_v56 = vmax.f32 %v1261_v41, 0.0  ;;  %v1518_v19 = vmax.f32 %v1310_v49, 0.0  ;;  %v1907_v18 = vmax.f32 %v1906_v59, %v1694_v3  ;;  %v1695_v22 = vunpack.c.l.bf16 %v1588_v35 }
 0x3b1   :  { %v1592_v8 = vpack.c.bf16 %v1512_v53, %v1511_v40  ;;  %v1696_v24 = vunpack.c.h.bf16 %v1588_v35 }
 0x3b2   :  { %v1595_v9 = vpack.c.bf16 %v1518_v19, %v1517_v56 }
 0x3b3   :  { %v1703_v31 = vunpack.c.l.bf16 %v1592_v8  ;;  %v1704_v28 = vunpack.c.h.bf16 %v1592_v8 }
 0x3b4   :  { %v1358_v21 = vpop.f32.mrf.mxu2  ;;  %v1407_v43 = vpop.f32.mrf.mxu3  ;;  %v1709_v27 = vunpack.c.l.bf16 %v1595_v9  ;;  %v1710_v30 = vunpack.c.h.bf16 %v1595_v9 }
 0x3b5   :  { %v1262_v26 = vpop.f32.mrf.mxu0  ;;  %v1311_v4 = vpop.f32.mrf.mxu1  ;;  %v1359_v62 = vadd.f32 %v1358_v21, %v3091_v61  ;;  %v1408_v55 = vadd.f32 %v1407_v43, %v3098_v44 }
 0x3b6   :  { %v1263_v51 = vadd.f32 %v1262_v26, %v3085_v29  ;;  %v1312_v52 = vadd.f32 %v1311_v4, %v3088_v33  ;;  %v1895_v26 = vmax.f32 %v1894_v17, %v1701_v12  ;;  %v1908_v4 = vmax.f32 %v1907_v18, %v1702_v13 }
 0x3b7   :  { %v1519_v23 = vmax.f32 %v1359_v62, 0.0  ;;  %v1520_v14 = vmax.f32 %v1408_v55, 0.0  ;;  %v1920_v62 = vmax.f32 %v1919_v1, %v1695_v22  ;;  %v1933_v55 = vmax.f32 %v1932_v20, %v1696_v24 }
 0x3b8   :  { %v1525_v7 = vmax.f32 %v1263_v51, 0.0  ;;  %v1526_v10 = vmax.f32 %v1312_v52, 0.0  ;;  %v1896_v51 = vmax.f32 %v1895_v26, %v1709_v27  ;;  %v1909_v52 = vmax.f32 %v1908_v4, %v1710_v30 }
 0x3b9   :  { %v1596_v34 = vpack.c.bf16 %v1520_v14, %v1519_v23 }
 0x3ba   :  { %v1599_v25 = vpack.c.bf16 %v1526_v10, %v1525_v7 }
 0x3bb   :  { %v1712_v2 = vunpack.c.h.bf16 %v1596_v34 }
 0x3bc   :  { %v1360_v63 = vpop.f32.mrf.mxu2  ;;  %v1409_v57 = vpop.f32.mrf.mxu3  ;;  %v1717_v47 = vunpack.c.l.bf16 %v1599_v25  ;;  %v1718_v48 = vunpack.c.h.bf16 %v1599_v25 }
 0x3bd   :  { %v1265_v58 = vpop.f32.mrf.mxu0  ;;  %v1314_v6 = vpop.f32.mrf.mxu1  ;;  %v1361_v21 = vadd.f32 %v1360_v63, %v3091_v61  ;;  %v1410_v43 = vadd.f32 %v1409_v57, %v3098_v44  ;;  %v1711_v63 = vunpack.c.l.bf16 %v1596_v34 }
 0x3be   :  { %v1266_v39 = vadd.f32 %v1265_v58, %v3085_v29  ;;  %v1315_v11 = vadd.f32 %v1314_v6, %v3088_v33  ;;  %v1897_v3 = vmax.f32 %v1896_v51, %v1717_v47  ;;  %v1910_v35 = vmax.f32 %v1909_v52, %v1718_v48 }
 0x3bf   :  { %v1527_v0 = vmax.f32 %v1361_v21, 0.0  ;;  %v1528_v42 = vmax.f32 %v1410_v43, 0.0  ;;  %v1921_v6 = vmax.f32 %v1920_v62, %v1703_v31 }
 0x3c0   :  { %v1533_v15 = vmax.f32 %v1266_v39, 0.0  ;;  %v1534_v16 = vmax.f32 %v1315_v11, 0.0 }
 0x3c1   :  { %v1600_v57 = vpack.c.bf16 %v1528_v42, %v1527_v0  ;;  %v1922_v14 = vmax.f32 %v1921_v6, %v1711_v63 }
 0x3c2   :  { %v1603_v36 = vpack.c.bf16 %v1534_v16, %v1533_v15 }
 0x3c3   :  { %v1719_v8 = vunpack.c.l.bf16 %v1600_v57  ;;  %v1720_v9 = vunpack.c.h.bf16 %v1600_v57 }
 0x3c4   :  { %v1363_v41 = vpop.f32.mrf.mxu2  ;;  %v1412_v49 = vpop.f32.mrf.mxu3  ;;  %v1725_v56 = vunpack.c.l.bf16 %v1603_v36  ;;  %v1726_v19 = vunpack.c.h.bf16 %v1603_v36 }
 0x3c5   :  { %v1364_v32 = vadd.f32 %v1363_v41, %v3091_v61  ;;  %v1413_v46 = vadd.f32 %v1412_v49, %v3098_v44  ;;  %v1267_v45 = vpop.f32.mrf.mxu0  ;;  %v1316_v37 = vpop.f32.mrf.mxu1  ;;  %v1923_v25 = vmax.f32 %v1922_v14, %v1719_v8  ;;  %v2046_v14 = vld.sshfl [vmem:[#allocation1 + $0x10] sm:$0xff pattern:$0x73625140] }
 0x3c6   :  { %v1268_v38 = vadd.f32 %v1267_v45, %v3085_v29  ;;  %v1317_v50 = vadd.f32 %v1316_v37, %v3088_v33  ;;  %v1934_v29 = vmax.f32 %v1933_v55, %v1704_v28  ;;  %v1898_v33 = vmax.f32 %v1897_v3, %v1725_v56 }
 0x3c7   :  { %v1535_v40 = vmax.f32 %v1364_v32, 0.0  ;;  %v1536_v53 = vmax.f32 %v1413_v46, 0.0  ;;  %v1911_v10 = vmax.f32 %v1910_v35, %v1726_v19 }
 0x3c8   :  { %v1541_v59 = vmax.f32 %v1268_v38, 0.0  ;;  %v1542_v60 = vmax.f32 %v1317_v50, 0.0  ;;  %v1935_v15 = vmax.f32 %v1934_v29, %v1712_v2 }
 0x3c9   :  { %v1604_v7 = vpack.c.bf16 %v1536_v53, %v1535_v40 }
 0x3ca   :  { %v1607_v58 = vpack.c.bf16 %v1542_v60, %v1541_v59  ;;  %v1936_v26 = vmax.f32 %v1935_v15, %v1720_v9  ;;  %v2047_v15 = vld.sshfl [vmem:[#allocation1 + $0x18] sm:$0xff pattern:$0x73625140] }
 0x3cb   :  { %v1727_v18 = vunpack.c.l.bf16 %v1604_v7  ;;  %v1728_v21 = vunpack.c.h.bf16 %v1604_v7 }
 0x3cc   :  { %v1733_v39 = vunpack.c.l.bf16 %v1607_v58  ;;  %v1734_v11 = vunpack.c.h.bf16 %v1607_v58  ;;  %v1365_v12 = vpop.f32.mrf.mxu2  ;;  %v1414_v13 = vpop.f32.mrf.mxu3 }
 0x3cd   :  { %v1366_v1 = vadd.f32 %v1365_v12, %v3091_v61  ;;  %v1415_v23 = vadd.f32 %v1414_v13, %v3098_v44  ;;  %v1924_v31 = vmax.f32 %v1923_v25, %v1727_v18  ;;  %v1937_v28 = vmax.f32 %v1936_v26, %v1728_v21 }
 0x3ce   :  { %v1899_v16 = vmax.f32 %v1898_v33, %v1733_v39  ;;  %v1912_v17 = vmax.f32 %v1911_v10, %v1734_v11  ;;  %v1955_v39 = vunpack.c.h.bf16 %v2682_v5 }
 0x3cf   :  { %v1543_v43 = vmax.f32 %v1366_v1, 0.0  ;;  %v1544_v20 = vmax.f32 %v1415_v23, 0.0  ;;  %v2044_v1 = vld.sshfl [vmem:[#allocation1] sm:$0xff pattern:$0x73625140] }
 0x3d0   :  { %v1900_v22 = vrot.slane %v1899_v16, 4  ;;  %v1913_v24 = vrot.slane %v1912_v17, 4  ;;  %v2045_v23 = vld.sshfl [vmem:[#allocation1 + $0x8] sm:$0xff pattern:$0x73625140] }
 0x3d1   :  { %v1608_v4 = vpack.c.bf16 %v1544_v20, %v1543_v43 }
 0x3d2   :  { %v1901_v27 = vmax.f32 %v1899_v16, %v1900_v22  ;;  %v1914_v30 = vmax.f32 %v1912_v17, %v1913_v24  ;;  %v2060_v16 = vpack.c.bf16 %v2045_v23, %v2044_v1  ;;  %v2061_v17 = vpack.c.bf16 %v2047_v15, %v2046_v14 }
 0x3d3   :  { %v1735_v61 = vunpack.c.l.bf16 %v1608_v4  ;;  %v1736_v34 = vunpack.c.h.bf16 %v1608_v4 }
 0x3d4   :  { %v1902_v44 = vrot.slane %v1901_v27, 2  ;;  %v1915_v36 = vrot.slane %v1914_v30, 2  ;;  %v2068_v18 = vrot.slane %v2060_v16, 3  ;;  %v2069_v5 = vrot.slane %v2061_v17, 6 }
 0x3d5   :  { %v1925_v41 = vmax.f32 %v1924_v31, %v1735_v61  ;;  %v1938_v49 = vmax.f32 %v1937_v28, %v1736_v34  ;;  %v2070_v21 = vrot.slane %v2061_v17, 1 }
 0x3d6   :  { %v1903_v0 = vmax.f32 %v1901_v27, %v1902_v44  ;;  %v1916_v42 = vmax.f32 %v1914_v30, %v1915_v36  ;;  %v2078_v31 = vsel %vm2075_vm9, %v2060_v16, %v2068_v18 }
 0x3d7   :  { %v1926_v32 = vrot.slane %v1925_v41, 4  ;;  %v1939_v46 = vrot.slane %v1938_v49, 4  ;;  %v2081_v28 = vsel %vm2014_vm8, %v2069_v5, %v2070_v21 }
 0x3d8   :  { %v1904_v45 = vrot.slane %v1903_v0, 1  ;;  %v1917_v37 = vrot.slane %v1916_v42, 1  ;;  %v2082_v44 = vsel %vm129_vm0, %v2078_v31, %v2081_v28 }
 0x3d9   :  { %v1927_v47 = vmax.f32 %v1925_v41, %v1926_v32  ;;  %v1940_v48 = vmax.f32 %v1938_v49, %v1939_v46 }
 0x3da   :  { %v1905_v38 = vmax.f32 %v1903_v0, %v1904_v45  ;;  %v1918_v50 = vmax.f32 %v1916_v42, %v1917_v37 }
 0x3db   :  { %v1928_v51 = vrot.slane %v1927_v47, 2  ;;  %v1941_v52 = vrot.slane %v1940_v48, 2 }
 0x3dc   :  { %v1951_v40 = vpack.c.bf16 %v1918_v50, %v1905_v38 }
 0x3dd   :  { %v1929_v53 = vmax.f32 %v1927_v47, %v1928_v51  ;;  %v1942_v56 = vmax.f32 %v1940_v48, %v1941_v52 }
 0x3de   :  { %v1969_v60 = vunpack.c.h.bf16 %v1951_v40  ;;  %v1968_v35 = vunpack.c.l.bf16 %v1951_v40 }
 0x3df   :  { %v1930_v19 = vrot.slane %v1929_v53, 1  ;;  %v1943_v59 = vrot.slane %v1942_v56, 1 }
 0x3e0   :  { %v1997_v57 = vrot.slane %v1969_v60, 6 }
 0x3e1   :  { %v1931_v62 = vmax.f32 %v1929_v53, %v1930_v19  ;;  %v1944_v55 = vmax.f32 %v1942_v56, %v1943_v59 }
 0x3e2   :  { %v2011_v29 = vsel %vm129_vm0, %v1968_v35, %v1997_v57 }
 0x3e3   :  { %v1952_v63 = vpack.c.bf16 %v1944_v55, %v1931_v62 }
 0x3e5   :  { %v1970_v2 = vunpack.c.l.bf16 %v1952_v63  ;;  %v1971_v3 = vunpack.c.h.bf16 %v1952_v63 }
 0x3e7   :  { %v1998_v58 = vrot.slane %v1970_v2, 4  ;;  %v1999_v6 = vrot.slane %v1971_v3, 2 }
 0x3e9   :  { %v2012_v7 = vsel %vm2001_vm2, %v1998_v58, %v1999_v6 }
 0x3ea   :  { %v2013_v33 = vsel %vm2003_vm3, %v2011_v29, %v2012_v7 }
 0x3eb   :  { %v2030_v10 = vrot.slane %v2013_v33, 7 }
 0x3ed   :  { %v2031_v11 = vsel %vm2020_vm4, %v2030_v10, %v3146_v54 }
 0x3ee   :  { %v2032_v12 = vsel %vm2022_vm5, %v2030_v10, %v2031_v11 }
 0x3ef   :  { %v2033_v13 = vsel %vm2024_vm6, %v2030_v10, %v2032_v12 }
 0x3f0   :  { %v2034_v8 = vsel %vm2026_vm7, %v2030_v10, %v2033_v13 }
 0x3f1   :  { %v2038_v9 = vmax.f32 %v1955_v39, %v2034_v8 }
 0x3f3   :  { %2043 = vst [vmem:[#allocation1 + $0x20] ss:$4 sm:$0xff] %v2038_v9 }
 0x3fa   :  { %v2048_v54 = vld.sshfl [vmem:[#allocation1 + $0x20] sm:$0xff pattern:$0x73625140]  ;;  %v2049_v43 = vld.sshfl [vmem:[#allocation1 + $0x28] sm:$0xff pattern:$0x73625140] }
 0x3fb   :  { %v2050_v20 = vld.sshfl [vmem:[#allocation1 + $0x30] sm:$0xff pattern:$0x73625140]  ;;  %v2051_v22 = vld.sshfl [vmem:[#allocation1 + $0x38] sm:$0xff pattern:$0x73625140]  ;;  %v2062_v24 = vpack.c.bf16 %v2049_v43, %v2048_v54 }
 0x3fc   :  { %v2063_v25 = vpack.c.bf16 %v2051_v22, %v2050_v20 }
 0x3fd   :  { %v2071_v26 = vrot.slane %v2062_v24, 4  ;;  %v2072_v4 = vrot.slane %v2062_v24, 7 }
 0x3fe   :  { %v2073_v27 = vrot.slane %v2063_v25, 2  ;;  %v2074_v30 = vrot.slane %v2063_v25, 5 }
 0x3ff   :  { %v2085_v61 = vsel %vm2015_vm10, %v2071_v26, %v2072_v4 }
 0x400   :  { %v2088_v34 = vsel %vm2017_vm11, %v2073_v27, %v2074_v30 }
 0x401   :  { %v2089_v36 = vsel %vm2001_vm2, %v2085_v61, %v2088_v34 }
 0x402   :  { %v2090_v41 = vsel %vm2003_vm3, %v2082_v44, %v2089_v36 }
 0x403   :  { %2097 = vst [vmem:[#allocation9] sm:$0xff] %v2090_v41 }
 0x404   :  { %2108 = dma.vmem_to_hbm [thread:$0]  %s2104_s26, 128, %s2106_s29, [#allocation5]  }
 0x405   :  { %2673 = dma.done.wait [#allocation5], 128  }
 0x406   :  { %2674 = vsyncadd [#allocation5], 4294967168 }
 0x407   :  { %2113 = vsyncpa [#allocation4], 1 }
 0x408   :  { %2114 = vsyncpa [#allocation7], 1 }
 0x409   :  { %2115 = vsyncpa [#allocation5], 1 }

</bundles_post_ra>
